<compile_context>
chip_gen: v5e
topology: v5e:2x2
jax: 0.10.0
libtpu: 0.0.40
codegen_flags: <defaults>
</compile_context>

<pallas_src>
import functools

import jax
import jax.numpy as jnp
from jax.experimental import pallas as pl
from jax.experimental.pallas import tpu as pltpu

EPS = 1e-5


def _round_up(x, m):
    return (x + m - 1) // m * m


def _bn_relu(h, gamma, beta):
    """BatchNorm1d (training mode, biased var) folded to scale/shift, then ReLU.

    h: (N, F) f32; gamma/beta: (1, F) f32. Single-pass stats (sum, sum-of-squares).
    Padded (all-zero) columns have gamma=0/beta=0 -> scale=0, shift=0 -> stay zero.
    """
    n_inv = 1.0 / h.shape[0]
    s = jnp.sum(h, axis=0, keepdims=True)
    ss = jnp.sum(h * h, axis=0, keepdims=True)
    mean = s * n_inv
    var = jnp.maximum(ss * n_inv - mean * mean, 0.0)
    scale = gamma * jax.lax.rsqrt(var + EPS)        # (1, F)
    shift = beta - mean * scale                     # (1, F)
    return jnp.maximum(h * scale + shift, 0.0)


def autoencoder_kernel(
    x_ref,
    w1_ref, g1_ref, be1_ref,
    w2_ref, g2_ref, be2_ref,
    w3_ref, g3_ref, be3_ref,
    w4_ref, b4_ref,
    out_ref,
):
    x = x_ref[...]  # (N, D) bf16

    # ---- encoder ----
    # Linear(D, 2H) [bias cancelled by BN] -> BN(train) -> ReLU
    h1 = jnp.dot(x, w1_ref[...], preferred_element_type=jnp.float32)
    h1 = _bn_relu(h1, g1_ref[...], be1_ref[...])

    # Linear(2H, H) [bias cancelled by BN] -> BN(train) -> ReLU
    h2 = jnp.dot(h1.astype(jnp.bfloat16), w2_ref[...],
                 preferred_element_type=jnp.float32)
    h2 = _bn_relu(h2, g2_ref[...], be2_ref[...])

    # ---- decoder ----
    # Linear(H, 2H) [bias cancelled by BN] -> BN(train) -> ReLU
    h3 = jnp.dot(h2.astype(jnp.bfloat16), w3_ref[...],
                 preferred_element_type=jnp.float32)
    h3 = _bn_relu(h3, g3_ref[...], be3_ref[...])

    # Linear(2H, D) + b4 -> sigmoid
    h4 = jnp.dot(h3.astype(jnp.bfloat16), w4_ref[...],
                 preferred_element_type=jnp.float32) + b4_ref[...]
    out_ref[...] = jax.nn.sigmoid(h4)


def prepare_params(params):
    """One-time preprocessing: lane-pad hidden dims to 128, cast matmul weights to bf16.

    b1..b3 are intentionally dropped (BatchNorm cancels them exactly). Gamma/beta are
    padded with zeros so padded columns stay exactly zero through BN + ReLU.
    Returns the flat tuple of kernel weight operands (everything except x).
    """
    f1 = params["w1"].shape[1]   # 2*hidden
    f2 = params["w2"].shape[1]   # hidden
    f3 = params["w3"].shape[1]   # 2*hidden
    f1p, f2p, f3p = (_round_up(f, 128) for f in (f1, f2, f3))

    w1 = jnp.pad(params["w1"], ((0, 0), (0, f1p - f1))).astype(jnp.bfloat16)
    w2 = jnp.pad(params["w2"], ((0, f1p - f1), (0, f2p - f2))).astype(jnp.bfloat16)
    w3 = jnp.pad(params["w3"], ((0, f2p - f2), (0, f3p - f3))).astype(jnp.bfloat16)
    w4 = jnp.pad(params["w4"], ((0, f3p - f3), (0, 0))).astype(jnp.bfloat16)
    g1 = jnp.pad(params["g1"], ((0, 0), (0, f1p - f1)))
    be1 = jnp.pad(params["be1"], ((0, 0), (0, f1p - f1)))
    g2 = jnp.pad(params["g2"], ((0, 0), (0, f2p - f2)))
    be2 = jnp.pad(params["be2"], ((0, 0), (0, f2p - f2)))
    g3 = jnp.pad(params["g3"], ((0, 0), (0, f3p - f3)))
    be3 = jnp.pad(params["be3"], ((0, 0), (0, f3p - f3)))
    b4 = params["b4"].astype(jnp.float32)
    return (w1, g1, be1, w2, g2, be2, w3, g3, be3, w4, b4)


@functools.partial(jax.jit, static_argnames=("num_channels", "img_side"))
def autoencoder_forward(x_nchw, prepared, *, num_channels, img_side):
    n = x_nchw.shape[0]
    data_size = num_channels * img_side * img_side
    x_flat = x_nchw.reshape(n, data_size).astype(jnp.bfloat16)  # x.view(-1, data_size)

    inputs = (x_flat,) + tuple(prepared)
    f1p = prepared[0].shape[1]
    f2p = prepared[3].shape[1]
    f3p = prepared[6].shape[1]

    # Advisory cost estimate for XLA's scheduler (matmul FLOPs, rsqrt + sigmoid, bytes).
    flops = 2 * n * (data_size * f1p + f1p * f2p + f2p * f3p + f3p * data_size)
    transcendentals = (f1p + f2p + f3p) + n * data_size
    bytes_accessed = (sum(int(a.size) * a.dtype.itemsize for a in inputs)
                      + n * data_size * 4)

    vmem_spec = pl.BlockSpec(memory_space=pltpu.MemorySpace.VMEM)
    out_flat = pl.pallas_call(
        autoencoder_kernel,
        out_shape=jax.ShapeDtypeStruct((n, data_size), jnp.float32),
        in_specs=[vmem_spec] * len(inputs),
        out_specs=vmem_spec,
        cost_estimate=pl.CostEstimate(
            flops=flops,
            transcendentals=transcendentals,
            bytes_accessed=bytes_accessed,
        ),
    )(*inputs)

    # nn.Unflatten(1, (C, H, W))
    return out_flat.reshape(n, num_channels, img_side, img_side)


def init_params(key, num_channels, img_side, hidden_size):
    """Deterministic init mirroring PyTorch layer shapes.

    Linear weights stored as (in_features, out_features) (W.T relative to torch),
    uniform(-1/sqrt(fan_in), 1/sqrt(fan_in)); biases likewise.
    BatchNorm gamma=1, beta=0, stored as (1, F) rows for lane broadcasting.
    """
    data_size = num_channels * img_side * img_side
    h = hidden_size
    dims = [
        (data_size, 2 * h),  # encoder linear 1
        (2 * h, h),          # encoder linear 2
        (h, 2 * h),          # decoder linear 1
        (2 * h, data_size),  # decoder linear 2
    ]
    params = {}
    keys = jax.random.split(key, 2 * len(dims))
    for i, (fan_in, fan_out) in enumerate(dims):
        bound = 1.0 / (fan_in ** 0.5)
        params[f"w{i+1}"] = jax.random.uniform(
            keys[2 * i], (fan_in, fan_out), jnp.float32, -bound, bound)
        params[f"b{i+1}"] = jax.random.uniform(
            keys[2 * i + 1], (1, fan_out), jnp.float32, -bound, bound)
    for i, (_, fan_out) in enumerate(dims[:3]):
        params[f"g{i+1}"] = jnp.ones((1, fan_out), jnp.float32)
        params[f"be{i+1}"] = jnp.zeros((1, fan_out), jnp.float32)
    return params


def reference_forward(x_nchw, params):
    """Pure-JAX reference of the module's math (biases included, two-pass BN).

    Matmul inputs are cast to bf16 to mirror the kernel's MXU precision choice;
    everything else is f32.
    """
    n = x_nchw.shape[0]
    x = x_nchw.reshape(n, -1)

    def mm(a, w):
        return jnp.dot(a.astype(jnp.bfloat16), w.astype(jnp.bfloat16),
                       preferred_element_type=jnp.float32)

    def bn(hh, g, b):
        m = hh.mean(0, keepdims=True)
        v = ((hh - m) ** 2).mean(0, keepdims=True)
        return (hh - m) / jnp.sqrt(v + EPS) * g + b

    hh = jnp.maximum(bn(mm(x, params["w1"]) + params["b1"], params["g1"], params["be1"]), 0.0)
    hh = jnp.maximum(bn(mm(hh, params["w2"]) + params["b2"], params["g2"], params["be2"]), 0.0)
    hh = jnp.maximum(bn(mm(hh, params["w3"]) + params["b3"], params["g3"], params["be3"]), 0.0)
    hh = jax.nn.sigmoid(mm(hh, params["w4"]) + params["b4"])
    return hh.reshape(x_nchw.shape)


if __name__ == "__main__":
    num_channels, img_side, hidden_size = 4, 16, 32
    batch = 8  # BatchNorm1d in training mode needs batch > 1; 8 fills the sublanes

    key = jax.random.PRNGKey(0)
    k_params, k_x = jax.random.split(key)
    params = init_params(k_params, num_channels, img_side, hidden_size)
    x = jax.random.uniform(k_x, (batch, num_channels, img_side, img_side), jnp.float32)

    prepared = prepare_params(params)  # one-time pad/cast, outside the hot path
    out = autoencoder_forward(x, prepared, num_channels=num_channels, img_side=img_side)
    out = jax.block_until_ready(out)

    ref = reference_forward(x, params)
    assert out.shape == (batch, num_channels, img_side, img_side)
    # Tolerance accounts for bf16 matmul inputs / MXU accumulation-order differences
    # and the (exact-in-math, ~1e-7-in-f32) BN cancellation of b1..b3.
    assert jnp.allclose(out, ref, atol=1e-2, rtol=1e-2), "mismatch vs reference"

    print("KERNEL_OK")
</pallas_src>

<mosaic_0001>
module attributes {stable_mosaic.version = 11 : i64} {
  func.func @autoencoder_kernel(%arg0: memref<8x1024xbf16, #tpu.memory_space<vmem>>, %arg1: memref<1024x128xbf16, #tpu.memory_space<vmem>>, %arg2: memref<1x128xf32, #tpu.memory_space<vmem>>, %arg3: memref<1x128xf32, #tpu.memory_space<vmem>>, %arg4: memref<128x128xbf16, #tpu.memory_space<vmem>>, %arg5: memref<1x128xf32, #tpu.memory_space<vmem>>, %arg6: memref<1x128xf32, #tpu.memory_space<vmem>>, %arg7: memref<128x128xbf16, #tpu.memory_space<vmem>>, %arg8: memref<1x128xf32, #tpu.memory_space<vmem>>, %arg9: memref<1x128xf32, #tpu.memory_space<vmem>>, %arg10: memref<128x1024xbf16, #tpu.memory_space<vmem>>, %arg11: memref<1x1024xf32, #tpu.memory_space<vmem>>, %arg12: memref<8x1024xf32, #tpu.memory_space<vmem>>) attributes {dimension_semantics = [], scalar_prefetch = 0 : i64, scratch_operands = 0 : i64, tpu.core_type = #tpu.core_type<tc>} {
    %c0 = arith.constant 0 : index
    %c0_0 = arith.constant 0 : index
    %0 = vector.load %arg0[%c0, %c0_0] : memref<8x1024xbf16, #tpu.memory_space<vmem>>, vector<8x1024xbf16>
    %c0_1 = arith.constant 0 : index
    %c0_2 = arith.constant 0 : index
    %1 = vector.load %arg1[%c0_1, %c0_2] : memref<1024x128xbf16, #tpu.memory_space<vmem>>, vector<1024x128xbf16>
    %cst = arith.constant dense<0.000000e+00> : vector<8x128xf32>
    %2 = tpu.matmul %0, %1, %cst {dimension_numbers = #tpu.dot_dimension_numbers<[1], [0], [0], [1], [0, 0, 1, 1], [], []>} : vector<8x1024xbf16>, vector<1024x128xbf16>, vector<8x128xf32> -> vector<8x128xf32>
    %c0_3 = arith.constant 0 : index
    %c0_4 = arith.constant 0 : index
    %3 = vector.load %arg2[%c0_3, %c0_4] : memref<1x128xf32, #tpu.memory_space<vmem>>, vector<1x128xf32>
    %c0_5 = arith.constant 0 : index
    %c0_6 = arith.constant 0 : index
    %4 = vector.load %arg3[%c0_5, %c0_6] : memref<1x128xf32, #tpu.memory_space<vmem>>, vector<1x128xf32>
    %cst_7 = arith.constant dense<0.000000e+00> : vector<128xf32>
    %5 = vector.multi_reduction <add>, %2, %cst_7 [0] : vector<8x128xf32> to vector<128xf32>
    %6 = vector.shape_cast %5 : vector<128xf32> to vector<1x128xf32>
    %7 = arith.mulf %2, %2 : vector<8x128xf32>
    %cst_8 = arith.constant dense<0.000000e+00> : vector<128xf32>
    %8 = vector.multi_reduction <add>, %7, %cst_8 [0] : vector<8x128xf32> to vector<128xf32>
    %9 = vector.shape_cast %8 : vector<128xf32> to vector<1x128xf32>
    %cst_9 = arith.constant 1.250000e-01 : f32
    %10 = vector.broadcast %cst_9 : f32 to vector<1x128xf32>
    %11 = arith.mulf %6, %10 : vector<1x128xf32>
    %cst_10 = arith.constant 1.250000e-01 : f32
    %12 = vector.broadcast %cst_10 : f32 to vector<1x128xf32>
    %13 = arith.mulf %9, %12 : vector<1x128xf32>
    %14 = arith.mulf %11, %11 : vector<1x128xf32>
    %15 = arith.subf %13, %14 : vector<1x128xf32>
    %cst_11 = arith.constant 0.000000e+00 : f32
    %16 = vector.broadcast %cst_11 : f32 to vector<1x128xf32>
    %17 = arith.maximumf %15, %16 : vector<1x128xf32>
    %cst_12 = arith.constant 9.99999974E-6 : f32
    %18 = vector.broadcast %cst_12 : f32 to vector<1x128xf32>
    %19 = arith.addf %17, %18 : vector<1x128xf32>
    %20 = math.rsqrt %19 : vector<1x128xf32>
    %21 = arith.mulf %3, %20 : vector<1x128xf32>
    %22 = arith.mulf %11, %21 : vector<1x128xf32>
    %23 = arith.subf %4, %22 : vector<1x128xf32>
    %24 = vector.broadcast %21 : vector<1x128xf32> to vector<8x128xf32>
    %25 = arith.mulf %2, %24 : vector<8x128xf32>
    %26 = vector.broadcast %23 : vector<1x128xf32> to vector<8x128xf32>
    %27 = arith.addf %25, %26 : vector<8x128xf32>
    %cst_13 = arith.constant 0.000000e+00 : f32
    %28 = vector.broadcast %cst_13 : f32 to vector<8x128xf32>
    %29 = arith.maximumf %27, %28 : vector<8x128xf32>
    %30 = arith.truncf %29 : vector<8x128xf32> to vector<8x128xbf16>
    %c0_14 = arith.constant 0 : index
    %c0_15 = arith.constant 0 : index
    %31 = vector.load %arg4[%c0_14, %c0_15] : memref<128x128xbf16, #tpu.memory_space<vmem>>, vector<128x128xbf16>
    %cst_16 = arith.constant dense<0.000000e+00> : vector<8x128xf32>
    %32 = tpu.matmul %30, %31, %cst_16 {dimension_numbers = #tpu.dot_dimension_numbers<[1], [0], [0], [1], [0, 0, 1, 1], [], []>} : vector<8x128xbf16>, vector<128x128xbf16>, vector<8x128xf32> -> vector<8x128xf32>
    %c0_17 = arith.constant 0 : index
    %c0_18 = arith.constant 0 : index
    %33 = vector.load %arg5[%c0_17, %c0_18] : memref<1x128xf32, #tpu.memory_space<vmem>>, vector<1x128xf32>
    %c0_19 = arith.constant 0 : index
    %c0_20 = arith.constant 0 : index
    %34 = vector.load %arg6[%c0_19, %c0_20] : memref<1x128xf32, #tpu.memory_space<vmem>>, vector<1x128xf32>
    %cst_21 = arith.constant dense<0.000000e+00> : vector<128xf32>
    %35 = vector.multi_reduction <add>, %32, %cst_21 [0] : vector<8x128xf32> to vector<128xf32>
    %36 = vector.shape_cast %35 : vector<128xf32> to vector<1x128xf32>
    %37 = arith.mulf %32, %32 : vector<8x128xf32>
    %cst_22 = arith.constant dense<0.000000e+00> : vector<128xf32>
    %38 = vector.multi_reduction <add>, %37, %cst_22 [0] : vector<8x128xf32> to vector<128xf32>
    %39 = vector.shape_cast %38 : vector<128xf32> to vector<1x128xf32>
    %cst_23 = arith.constant 1.250000e-01 : f32
    %40 = vector.broadcast %cst_23 : f32 to vector<1x128xf32>
    %41 = arith.mulf %36, %40 : vector<1x128xf32>
    %cst_24 = arith.constant 1.250000e-01 : f32
    %42 = vector.broadcast %cst_24 : f32 to vector<1x128xf32>
    %43 = arith.mulf %39, %42 : vector<1x128xf32>
    %44 = arith.mulf %41, %41 : vector<1x128xf32>
    %45 = arith.subf %43, %44 : vector<1x128xf32>
    %cst_25 = arith.constant 0.000000e+00 : f32
    %46 = vector.broadcast %cst_25 : f32 to vector<1x128xf32>
    %47 = arith.maximumf %45, %46 : vector<1x128xf32>
    %cst_26 = arith.constant 9.99999974E-6 : f32
    %48 = vector.broadcast %cst_26 : f32 to vector<1x128xf32>
    %49 = arith.addf %47, %48 : vector<1x128xf32>
    %50 = math.rsqrt %49 : vector<1x128xf32>
    %51 = arith.mulf %33, %50 : vector<1x128xf32>
    %52 = arith.mulf %41, %51 : vector<1x128xf32>
    %53 = arith.subf %34, %52 : vector<1x128xf32>
    %54 = vector.broadcast %51 : vector<1x128xf32> to vector<8x128xf32>
    %55 = arith.mulf %32, %54 : vector<8x128xf32>
    %56 = vector.broadcast %53 : vector<1x128xf32> to vector<8x128xf32>
    %57 = arith.addf %55, %56 : vector<8x128xf32>
    %cst_27 = arith.constant 0.000000e+00 : f32
    %58 = vector.broadcast %cst_27 : f32 to vector<8x128xf32>
    %59 = arith.maximumf %57, %58 : vector<8x128xf32>
    %60 = arith.truncf %59 : vector<8x128xf32> to vector<8x128xbf16>
    %c0_28 = arith.constant 0 : index
    %c0_29 = arith.constant 0 : index
    %61 = vector.load %arg7[%c0_28, %c0_29] : memref<128x128xbf16, #tpu.memory_space<vmem>>, vector<128x128xbf16>
    %cst_30 = arith.constant dense<0.000000e+00> : vector<8x128xf32>
    %62 = tpu.matmul %60, %61, %cst_30 {dimension_numbers = #tpu.dot_dimension_numbers<[1], [0], [0], [1], [0, 0, 1, 1], [], []>} : vector<8x128xbf16>, vector<128x128xbf16>, vector<8x128xf32> -> vector<8x128xf32>
    %c0_31 = arith.constant 0 : index
    %c0_32 = arith.constant 0 : index
    %63 = vector.load %arg8[%c0_31, %c0_32] : memref<1x128xf32, #tpu.memory_space<vmem>>, vector<1x128xf32>
    %c0_33 = arith.constant 0 : index
    %c0_34 = arith.constant 0 : index
    %64 = vector.load %arg9[%c0_33, %c0_34] : memref<1x128xf32, #tpu.memory_space<vmem>>, vector<1x128xf32>
    %cst_35 = arith.constant dense<0.000000e+00> : vector<128xf32>
    %65 = vector.multi_reduction <add>, %62, %cst_35 [0] : vector<8x128xf32> to vector<128xf32>
    %66 = vector.shape_cast %65 : vector<128xf32> to vector<1x128xf32>
    %67 = arith.mulf %62, %62 : vector<8x128xf32>
    %cst_36 = arith.constant dense<0.000000e+00> : vector<128xf32>
    %68 = vector.multi_reduction <add>, %67, %cst_36 [0] : vector<8x128xf32> to vector<128xf32>
    %69 = vector.shape_cast %68 : vector<128xf32> to vector<1x128xf32>
    %cst_37 = arith.constant 1.250000e-01 : f32
    %70 = vector.broadcast %cst_37 : f32 to vector<1x128xf32>
    %71 = arith.mulf %66, %70 : vector<1x128xf32>
    %cst_38 = arith.constant 1.250000e-01 : f32
    %72 = vector.broadcast %cst_38 : f32 to vector<1x128xf32>
    %73 = arith.mulf %69, %72 : vector<1x128xf32>
    %74 = arith.mulf %71, %71 : vector<1x128xf32>
    %75 = arith.subf %73, %74 : vector<1x128xf32>
    %cst_39 = arith.constant 0.000000e+00 : f32
    %76 = vector.broadcast %cst_39 : f32 to vector<1x128xf32>
    %77 = arith.maximumf %75, %76 : vector<1x128xf32>
    %cst_40 = arith.constant 9.99999974E-6 : f32
    %78 = vector.broadcast %cst_40 : f32 to vector<1x128xf32>
    %79 = arith.addf %77, %78 : vector<1x128xf32>
    %80 = math.rsqrt %79 : vector<1x128xf32>
    %81 = arith.mulf %63, %80 : vector<1x128xf32>
    %82 = arith.mulf %71, %81 : vector<1x128xf32>
    %83 = arith.subf %64, %82 : vector<1x128xf32>
    %84 = vector.broadcast %81 : vector<1x128xf32> to vector<8x128xf32>
    %85 = arith.mulf %62, %84 : vector<8x128xf32>
    %86 = vector.broadcast %83 : vector<1x128xf32> to vector<8x128xf32>
    %87 = arith.addf %85, %86 : vector<8x128xf32>
    %cst_41 = arith.constant 0.000000e+00 : f32
    %88 = vector.broadcast %cst_41 : f32 to vector<8x128xf32>
    %89 = arith.maximumf %87, %88 : vector<8x128xf32>
    %90 = arith.truncf %89 : vector<8x128xf32> to vector<8x128xbf16>
    %c0_42 = arith.constant 0 : index
    %c0_43 = arith.constant 0 : index
    %91 = vector.load %arg10[%c0_42, %c0_43] : memref<128x1024xbf16, #tpu.memory_space<vmem>>, vector<128x1024xbf16>
    %cst_44 = arith.constant dense<0.000000e+00> : vector<8x1024xf32>
    %92 = tpu.matmul %90, %91, %cst_44 {dimension_numbers = #tpu.dot_dimension_numbers<[1], [0], [0], [1], [0, 0, 1, 1], [], []>} : vector<8x128xbf16>, vector<128x1024xbf16>, vector<8x1024xf32> -> vector<8x1024xf32>
    %c0_45 = arith.constant 0 : index
    %c0_46 = arith.constant 0 : index
    %93 = vector.load %arg11[%c0_45, %c0_46] : memref<1x1024xf32, #tpu.memory_space<vmem>>, vector<1x1024xf32>
    %94 = vector.broadcast %93 : vector<1x1024xf32> to vector<8x1024xf32>
    %95 = arith.addf %92, %94 : vector<8x1024xf32>
    %96 = arith.negf %95 : vector<8x1024xf32>
    %97 = math.exp %96 : vector<8x1024xf32>
    %cst_47 = arith.constant 1.000000e+00 : f32
    %98 = vector.broadcast %cst_47 : f32 to vector<8x1024xf32>
    %99 = arith.addf %98, %97 : vector<8x1024xf32>
    %100 = arith.divf %98, %99 : vector<8x1024xf32>
    %c0_48 = arith.constant 0 : index
    %c0_49 = arith.constant 0 : index
    %101 = vector.load %arg12[%c0_48, %c0_49] : memref<8x1024xf32, #tpu.memory_space<vmem>>, vector<8x1024xf32>
    tpu.vector_store %arg12[%c0_48, %c0_49], %100 {strides = array<i32>} : memref<8x1024xf32, #tpu.memory_space<vmem>>, vector<8x1024xf32>,
    return
  }
}

</mosaic_0001>

<bundles_post_ra>
// kernel: autoencoder_forward.1
= control target key start
LH: loop header
LB: loop body
LE: loop exit
PB: predicated region body
PF: predicated region fallthrough
CT: control target
= control target key end

     0   :  { %17 = vsyncpa [#allocation3], 0  ;;  %s3286_s0 = inlined_call_operand.vmem [shape: bf16[8,1024], index: 0, kind: input, shape index: {}]   ;;  %s3287_s1 = inlined_call_operand.vmem [shape: bf16[1024,128], index: 1, kind: input, shape index: {}]   ;;  %s3288_s2 = inlined_call_operand.vmem [shape: f32[1,128], index: 2, kind: input, shape index: {}]   ;;  %s3289_s3 = inlined_call_operand.vmem [shape: f32[1,128], index: 3, kind: input, shape index: {}]   ;;  %s3290_s4 = inlined_call_operand.hbm [shape: bf16[128,128], index: 4, kind: input, shape index: {}]   ;;  %s3291_s5 = inlined_call_operand.vmem [shape: f32[1,128], index: 5, kind: input, shape index: {}]   ;;  %s3292_s6 = inlined_call_operand.vmem [shape: f32[1,128], index: 6, kind: input, shape index: {}]   ;;  %s3293_s7 = inlined_call_operand.hbm [shape: bf16[128,128], index: 7, kind: input, shape index: {}]   ;;  %s3294_s8 = inlined_call_operand.vmem [shape: f32[1,128], index: 8, kind: input, shape index: {}]   ;;  %s3295_s9 = inlined_call_operand.vmem [shape: f32[1,128], index: 9, kind: input, shape index: {}]   ;;  %s3296_s10 = inlined_call_operand.vmem [shape: bf16[128,1024], index: 10, kind: input, shape index: {}]   ;;  %s3297_s11 = inlined_call_operand.vmem [shape: f32[1,1024], index: 11, kind: input, shape index: {}]   ;;  %s3298_s12 = inlined_call_operand.vmem [shape: f32[8,1024], index: 12, kind: output, shape index: {}]  }
   0x1   :  { %s31_s23 = sshll.u32 %s3290_s4, 4  ;;  %s32_s23 = int_to_ptr.hbm [resolvable:$true] %s31_s23 }
   0x2   :  { %18 = vsyncpa [#allocation5], 0  ;;  %s2501_s24 = smov [#allocation2]   ;;  %s48_s28 = sshll.u32 %s3293_s7, 4  ;;  %s49_s28 = int_to_ptr.hbm [resolvable:$true] %s48_s28 }
   0x3   :  { %s33_s25 = sshll.u32 %s2501_s24, 4  ;;  %s2502_s29 = smov 64   ;;  %s34_s25 = int_to_ptr.vmem [resolvable:$true] %s33_s25 }
   0x4   :  { %s2503_s30 = smov 4   ;;  %s2504_s13 = smov [#allocation4]  }
   0x5   :  { %39 = dma.hbm_to_vmem [thread:$0]  %s32_s23, 1024, %s34_s25, [#allocation3], %s2502_s29, %s2502_s29, %s2503_s30  }
   0x6   :  { %s50_s14 = sshll.u32 %s2504_s13, 4  ;;  %s51_s14 = int_to_ptr.vmem [resolvable:$true] %s50_s14 }
   0x7   :  { %56 = dma.hbm_to_vmem [thread:$0]  %s49_s28, 1024, %s51_s14, [#allocation5], %s2502_s29, %s2502_s29, %s2503_s30  }
   0x8   :  { %2497 = dma.done.wait [#allocation3], 1024  }
   0x9   :  { %2498 = vsyncadd [#allocation3], 4294966272 }
   0xa   :  { %2499 = dma.done.wait [#allocation5], 1024  }
   0xb   :  { %2500 = vsyncadd [#allocation5], 4294966272  ;;  %v2270_v0 = vld [vmem:[%s3287_s1 + $0x38] sm:$0xff]  ;;  %v2269_v4 = vld [vmem:[%s3287_s1 + $0x30] sm:$0xff] }
   0xc   :  { %v2278_v1 = vld [vmem:[%s3287_s1 + $0x78] sm:$0xff]  ;;  %617 = vmatpush.bf16.msra.mxu0 %v2270_v0  ;;  %v2277_v5 = vld [vmem:[%s3287_s1 + $0x70] sm:$0xff]  ;;  %v2268_v8 = vld [vmem:[%s3287_s1 + $0x28] sm:$0xff] }
   0xd   :  { %v2286_v2 = vld [vmem:[%s3287_s1 + $0xb8] sm:$0xff]  ;;  %630 = vmatpush.bf16.msra.mxu1 %v2278_v1  ;;  %v2285_v6 = vld [vmem:[%s3287_s1 + $0xb0] sm:$0xff]  ;;  %v2276_v9 = vld [vmem:[%s3287_s1 + $0x68] sm:$0xff] }
   0xe   :  { %v2294_v3 = vld [vmem:[%s3287_s1 + $0xf8] sm:$0xff]  ;;  %643 = vmatpush.bf16.msra.mxu2 %v2286_v2  ;;  %v2293_v7 = vld [vmem:[%s3287_s1 + $0xf0] sm:$0xff]  ;;  %v2284_v10 = vld [vmem:[%s3287_s1 + $0xa8] sm:$0xff] }
   0xf   :  { %656 = vmatpush.bf16.msra.mxu3 %v2294_v3  ;;  %v2292_v11 = vld [vmem:[%s3287_s1 + $0xe8] sm:$0xff]  ;;  %v2267_v12 = vld [vmem:[%s3287_s1 + $0x20] sm:$0xff]  ;;  %v2266_v16 = vld [vmem:[%s3287_s1 + $0x18] sm:$0xff] }
  0x10   :  { %618 = vmatpush.bf16.msra.mxu0 %v2269_v4  ;;  %v2275_v13 = vld [vmem:[%s3287_s1 + $0x60] sm:$0xff]  ;;  %v2274_v17 = vld [vmem:[%s3287_s1 + $0x58] sm:$0xff]  ;;  %v2265_v20 = vld [vmem:[%s3287_s1 + $0x10] sm:$0xff] }
  0x11   :  { %631 = vmatpush.bf16.msra.mxu1 %v2277_v5  ;;  %v2283_v14 = vld [vmem:[%s3287_s1 + $0xa0] sm:$0xff]  ;;  %v2282_v18 = vld [vmem:[%s3287_s1 + $0x98] sm:$0xff]  ;;  %v2273_v21 = vld [vmem:[%s3287_s1 + $0x50] sm:$0xff] }
  0x12   :  { %644 = vmatpush.bf16.msra.mxu2 %v2285_v6  ;;  %v2291_v15 = vld [vmem:[%s3287_s1 + $0xe0] sm:$0xff]  ;;  %v2290_v19 = vld [vmem:[%s3287_s1 + $0xd8] sm:$0xff]  ;;  %v2281_v22 = vld [vmem:[%s3287_s1 + $0x90] sm:$0xff] }
  0x13   :  { %657 = vmatpush.bf16.msra.mxu3 %v2293_v7  ;;  %v2289_v23 = vld [vmem:[%s3287_s1 + $0xd0] sm:$0xff]  ;;  %v2264_v24 = vld [vmem:[%s3287_s1 + $0x8] sm:$0xff]  ;;  %v73_v29 = vld [vmem:[%s3286_s0] sm:$0xff] }
  0x14   :  { %619 = vmatpush.bf16.msra.mxu0 %v2268_v8  ;;  %v2272_v25 = vld [vmem:[%s3287_s1 + $0x48] sm:$0xff]  ;;  %v2263_v30 = vld [vmem:[%s3287_s1] sm:$0xff]  ;;  %v209_v33 = vunpack.c.l.b16 %v73_v29  ;;  %v210_v37 = vunpack.c.h.b16 %v73_v29  ;;  %v2302_v38 = vld [vmem:[%s3287_s1 + $0x138] sm:$0xff] }
  0x15   :  { %632 = vmatpush.bf16.msra.mxu1 %v2276_v9  ;;  %v2280_v26 = vld [vmem:[%s3287_s1 + $0x88] sm:$0xff]  ;;  %v2271_v31 = vld [vmem:[%s3287_s1 + $0x40] sm:$0xff]  ;;  %v2310_v39 = vld [vmem:[%s3287_s1 + $0x178] sm:$0xff] }
  0x16   :  { %645 = vmatpush.bf16.msra.mxu2 %v2284_v10  ;;  %v2288_v27 = vld [vmem:[%s3287_s1 + $0xc8] sm:$0xff]  ;;  %v2279_v34 = vld [vmem:[%s3287_s1 + $0x80] sm:$0xff]  ;;  %v2318_v40 = vld [vmem:[%s3287_s1 + $0x1b8] sm:$0xff]  ;;  %v217_v43 = vpack.c.b16 %v209_v33, %v209_v33  ;;  %v218_v45 = vpack.c.b16 %v210_v37, %v210_v37 }
  0x17   :  { %658 = vmatpush.bf16.msra.mxu3 %v2292_v11  ;;  %v74_v28 = vld [vmem:[%s3286_s0 + $0x8] sm:$0xff]  ;;  %v2287_v35 = vld [vmem:[%s3287_s1 + $0xc0] sm:$0xff]  ;;  %v2326_v41 = vld [vmem:[%s3287_s1 + $0x1f8] sm:$0xff] }
  0x18   :  { %620 = vmatpush.bf16.msra.mxu0 %v2267_v12  ;;  %v211_v32 = vunpack.c.l.b16 %v74_v28  ;;  %v212_v36 = vunpack.c.h.b16 %v74_v28  ;;  %v2301_v46 = vld [vmem:[%s3287_s1 + $0x130] sm:$0xff]  ;;  %v2300_v50 = vld [vmem:[%s3287_s1 + $0x128] sm:$0xff]  ;;  %v2299_v54 = vld [vmem:[%s3287_s1 + $0x120] sm:$0xff] }
  0x19   :  { %633 = vmatpush.bf16.msra.mxu1 %v2275_v13  ;;  %v2309_v47 = vld [vmem:[%s3287_s1 + $0x170] sm:$0xff]  ;;  %v2308_v51 = vld [vmem:[%s3287_s1 + $0x168] sm:$0xff]  ;;  %v2307_v55 = vld [vmem:[%s3287_s1 + $0x160] sm:$0xff] }
  0x1a   :  { %646 = vmatpush.bf16.msra.mxu2 %v2283_v14  ;;  %v219_v42 = vpack.c.b16 %v211_v32, %v211_v32  ;;  %v220_v44 = vpack.c.b16 %v212_v36, %v212_v36  ;;  %v2317_v48 = vld [vmem:[%s3287_s1 + $0x1b0] sm:$0xff]  ;;  %v2316_v52 = vld [vmem:[%s3287_s1 + $0x1a8] sm:$0xff]  ;;  %v2315_v56 = vld [vmem:[%s3287_s1 + $0x1a0] sm:$0xff] }
  0x1b   :  { %659 = vmatpush.bf16.msra.mxu3 %v2291_v15  ;;  %v2325_v49 = vld [vmem:[%s3287_s1 + $0x1f0] sm:$0xff]  ;;  %v2324_v53 = vld [vmem:[%s3287_s1 + $0x1e8] sm:$0xff]  ;;  %v2323_v57 = vld [vmem:[%s3287_s1 + $0x1e0] sm:$0xff] }
  0x1c   :  { %621 = vmatpush.bf16.msra.mxu0 %v2266_v16  ;;  %v2298_v58 = vld [vmem:[%s3287_s1 + $0x118] sm:$0xff]  ;;  %v2297_v62 = vld [vmem:[%s3287_s1 + $0x110] sm:$0xff]  ;;  %v2296_v2 = vld [vmem:[%s3287_s1 + $0x108] sm:$0xff] }
  0x1d   :  { %634 = vmatpush.bf16.msra.mxu1 %v2274_v17  ;;  %v2306_v59 = vld [vmem:[%s3287_s1 + $0x158] sm:$0xff]  ;;  %v2305_v63 = vld [vmem:[%s3287_s1 + $0x150] sm:$0xff]  ;;  %v2304_v3 = vld [vmem:[%s3287_s1 + $0x148] sm:$0xff] }
  0x1e   :  { %647 = vmatpush.bf16.msra.mxu2 %v2282_v18  ;;  %v2314_v60 = vld [vmem:[%s3287_s1 + $0x198] sm:$0xff]  ;;  %v2313_v0 = vld [vmem:[%s3287_s1 + $0x190] sm:$0xff]  ;;  %v2312_v5 = vld [vmem:[%s3287_s1 + $0x188] sm:$0xff] }
  0x1f   :  { %660 = vmatpush.bf16.msra.mxu3 %v2290_v19  ;;  %v2322_v61 = vld [vmem:[%s3287_s1 + $0x1d8] sm:$0xff]  ;;  %v2321_v1 = vld [vmem:[%s3287_s1 + $0x1d0] sm:$0xff]  ;;  %v2320_v6 = vld [vmem:[%s3287_s1 + $0x1c8] sm:$0xff] }
  0x20   :  { %622 = vmatpush.bf16.msra.mxu0 %v2265_v20  ;;  %v75_v4 = vld [vmem:[%s3286_s0 + $0x10] sm:$0xff]  ;;  %v76_v7 = vld [vmem:[%s3286_s0 + $0x18] sm:$0xff]  ;;  %v2295_v10 = vld [vmem:[%s3287_s1 + $0x100] sm:$0xff] }
  0x21   :  { %635 = vmatpush.bf16.msra.mxu1 %v2273_v21  ;;  %v213_v8 = vunpack.c.l.b16 %v75_v4  ;;  %v214_v9 = vunpack.c.h.b16 %v75_v4  ;;  %v2303_v11 = vld [vmem:[%s3287_s1 + $0x140] sm:$0xff]  ;;  %v215_v12 = vunpack.c.l.b16 %v76_v7  ;;  %v216_v13 = vunpack.c.h.b16 %v76_v7  ;;  %v2334_v33 = vld [vmem:[#allocation2 + $0x38] sm:$0xff] }
  0x22   :  { %648 = vmatpush.bf16.msra.mxu2 %v2281_v22  ;;  %v2311_v14 = vld [vmem:[%s3287_s1 + $0x180] sm:$0xff] }
  0x23   :  { %661 = vmatpush.bf16.msra.mxu3 %v2289_v23  ;;  %v2319_v15 = vld [vmem:[%s3287_s1 + $0x1c0] sm:$0xff]  ;;  %v221_v16 = vpack.c.b16 %v213_v8, %v213_v8  ;;  %v222_v17 = vpack.c.b16 %v214_v9, %v214_v9  ;;  %v223_v18 = vpack.c.b16 %v215_v12, %v215_v12  ;;  %v224_v19 = vpack.c.b16 %v216_v13, %v216_v13 }
  0x24   :  { %623 = vmatpush.bf16.msra.mxu0 %v2264_v24 }
  0x25   :  { %636 = vmatpush.bf16.msra.mxu1 %v2272_v25 }
  0x26   :  { %649 = vmatpush.bf16.msra.mxu2 %v2280_v26 }
  0x27   :  { %662 = vmatpush.bf16.msra.mxu3 %v2288_v27 }
  0x28   :  { %624 = vmatpush.bf16.msra.mxu0 %v2263_v30 }
  0x29   :  { %637 = vmatpush.bf16.msra.mxu1 %v2271_v31 }
  0x2a   :  { %650 = vmatpush.bf16.msra.mxu2 %v2279_v34 }
  0x2b   :  { %663 = vmatpush.bf16.msra.mxu3 %v2287_v35  ;;  %625 = vmatmul.bf16.vlgmr.msra.gmra.mxu0 %v217_v43  ;;  %v2333_v35 = vld [vmem:[#allocation2 + $0x30] sm:$0xff] }
  0x2c   :  { %669 = vmatpush.bf16.msrb.mxu0 %v2302_v38  ;;  %638 = vmatmul.bf16.vlgmr.msra.gmra.mxu1 %v218_v45 }
  0x2d   :  { %682 = vmatpush.bf16.msrb.mxu1 %v2310_v39  ;;  %651 = vmatmul.bf16.vlgmr.msra.gmra.mxu2 %v219_v42  ;;  %v2332_v42 = vld [vmem:[#allocation2 + $0x28] sm:$0xff] }
  0x2e   :  { %695 = vmatpush.bf16.msrb.mxu2 %v2318_v40  ;;  %664 = vmatmul.bf16.vlgmr.msra.gmra.mxu3 %v220_v44 }
  0x2f   :  { %708 = vmatpush.bf16.msrb.mxu3 %v2326_v41 }
  0x30   :  { %670 = vmatpush.bf16.msrb.mxu0 %v2301_v46  ;;  %v2331_v46 = vld [vmem:[#allocation2 + $0x20] sm:$0xff] }
  0x31   :  { %683 = vmatpush.bf16.msrb.mxu1 %v2309_v47 }
  0x32   :  { %696 = vmatpush.bf16.msrb.mxu2 %v2317_v48 }
  0x33   :  { %709 = vmatpush.bf16.msrb.mxu3 %v2325_v49 }
  0x34   :  { %671 = vmatpush.bf16.msrb.mxu0 %v2300_v50 }
  0x35   :  { %684 = vmatpush.bf16.msrb.mxu1 %v2308_v51 }
  0x36   :  { %697 = vmatpush.bf16.msrb.mxu2 %v2316_v52 }
  0x37   :  { %710 = vmatpush.bf16.msrb.mxu3 %v2324_v53  ;;  %v2330_v53 = vld [vmem:[#allocation2 + $0x18] sm:$0xff] }
  0x38   :  { %672 = vmatpush.bf16.msrb.mxu0 %v2299_v54 }
  0x39   :  { %685 = vmatpush.bf16.msrb.mxu1 %v2307_v55 }
  0x3a   :  { %698 = vmatpush.bf16.msrb.mxu2 %v2315_v56 }
  0x3b   :  { %711 = vmatpush.bf16.msrb.mxu3 %v2323_v57 }
  0x3c   :  { %673 = vmatpush.bf16.msrb.mxu0 %v2298_v58  ;;  %v2329_v58 = vld [vmem:[#allocation2 + $0x10] sm:$0xff] }
  0x3d   :  { %686 = vmatpush.bf16.msrb.mxu1 %v2306_v59 }
  0x3e   :  { %699 = vmatpush.bf16.msrb.mxu2 %v2314_v60 }
  0x3f   :  { %712 = vmatpush.bf16.msrb.mxu3 %v2322_v61 }
  0x40   :  { %674 = vmatpush.bf16.msrb.mxu0 %v2297_v62 }
  0x41   :  { %687 = vmatpush.bf16.msrb.mxu1 %v2305_v63  ;;  %v2328_v63 = vld [vmem:[#allocation2 + $0x8] sm:$0xff] }
  0x42   :  { %700 = vmatpush.bf16.msrb.mxu2 %v2313_v0 }
  0x43   :  { %713 = vmatpush.bf16.msrb.mxu3 %v2321_v1 }
  0x44   :  { %675 = vmatpush.bf16.msrb.mxu0 %v2296_v2  ;;  %v2327_v2 = vld [vmem:[#allocation2] sm:$0xff] }
  0x45   :  { %688 = vmatpush.bf16.msrb.mxu1 %v2304_v3 }
  0x46   :  { %701 = vmatpush.bf16.msrb.mxu2 %v2312_v5 }
  0x47   :  { %714 = vmatpush.bf16.msrb.mxu3 %v2320_v6 }
  0x48   :  { %676 = vmatpush.bf16.msrb.mxu0 %v2295_v10 }
  0x49   :  { %689 = vmatpush.bf16.msrb.mxu1 %v2303_v11  ;;  %v721_v11 = vld [vmem:[%s3288_s2] sm:$0x1] }
  0x4a   :  { %702 = vmatpush.bf16.msrb.mxu2 %v2311_v14 }
  0x4b   :  { %715 = vmatpush.bf16.msrb.mxu3 %v2319_v15  ;;  %677 = vmatmul.bf16.vlgmr.msrb.gmra.mxu0 %v221_v16  ;;  %v722_v15 = vld [vmem:[%s3289_s3] sm:$0x1] }
  0x4c   :  { %690 = vmatmul.bf16.vlgmr.msrb.gmra.mxu1 %v222_v17  ;;  %829 = vmatpush.bf16.msra.mxu0 %v2334_v33 }
  0x4d   :  { %703 = vmatmul.bf16.vlgmr.msrb.gmra.mxu2 %v223_v18 }
  0x4e   :  { %716 = vmatmul.bf16.vlgmr.msrb.gmra.mxu3 %v224_v19 }
  0x50   :  { %830 = vmatpush.bf16.msra.mxu0 %v2333_v35  ;;  %v2338_v35 = vld [vmem:[#allocation4 + $0x18] sm:$0xff] }
  0x54   :  { %831 = vmatpush.bf16.msra.mxu0 %v2332_v42 }
  0x58   :  { %832 = vmatpush.bf16.msra.mxu0 %v2331_v46  ;;  %v2336_v46 = vld [vmem:[#allocation4 + $0x8] sm:$0xff] }
  0x5c   :  { %833 = vmatpush.bf16.msra.mxu0 %v2330_v53 }
  0x60   :  { %834 = vmatpush.bf16.msra.mxu0 %v2329_v58  ;;  %v842_v58 = vld [vmem:[%s3291_s5] sm:$0x1] }
  0x64   :  { %835 = vmatpush.bf16.msra.mxu0 %v2328_v63 }
  0x68   :  { %836 = vmatpush.bf16.msra.mxu0 %v2327_v2 }
  0xa8   :  { %v626_v20 = vpop.f32.mrf.mxu0 }
  0xa9   :  { %v639_v21 = vpop.f32.mrf.mxu1 }
  0xaa   :  { %v640_v28 = vadd.f32 %v639_v21, %v626_v20 }
  0xb0   :  { %v652_v22 = vpop.f32.mrf.mxu2  ;;  %v628_v24 = vpop.f32.mrf.mxu0 }
  0xb1   :  { %v665_v23 = vpop.f32.mrf.mxu3  ;;  %v641_v25 = vpop.f32.mrf.mxu1  ;;  %v653_v29 = vadd.f32 %v652_v22, %v640_v28  ;;  %v2342_v24 = vld [vmem:[#allocation4 + $0x38] sm:$0xff] }
  0xb2   :  { %950 = vmatpush.bf16.msra.mxu1 %v2342_v24  ;;  %v2341_v25 = vld [vmem:[#allocation4 + $0x30] sm:$0xff]  ;;  %v2201_v24 = vld [vmem:[%s3296_s10 + $0x188] sm:$0xf] }
  0xb3   :  { %v666_v30 = vadd.f32 %v665_v23, %v653_v29 }
  0xb6   :  { %951 = vmatpush.bf16.msra.mxu1 %v2341_v25  ;;  %v2396_v25 = vld [vmem:[%s3296_s10 + $0x1a4] sm:$0xf0] }
  0xb8   :  { %v654_v26 = vpop.f32.mrf.mxu2 }
  0xb9   :  { %v667_v27 = vpop.f32.mrf.mxu3  ;;  %v2340_v26 = vld [vmem:[#allocation4 + $0x28] sm:$0xff] }
  0xba   :  { %952 = vmatpush.bf16.msra.mxu1 %v2340_v26 }
  0xc8   :  { %v678_v31 = vpop.f32.mrf.mxu0 }
  0xc9   :  { %v691_v32 = vpop.f32.mrf.mxu1  ;;  %v679_v34 = vadd.f32 %v678_v31, %v666_v30  ;;  %v2339_v30 = vld [vmem:[#allocation4 + $0x20] sm:$0xff] }
  0xca   :  { %953 = vmatpush.bf16.msra.mxu1 %v2339_v30 }
  0xcb   :  { %v692_v36 = vadd.f32 %v691_v32, %v679_v34 }
  0xce   :  { %954 = vmatpush.bf16.msra.mxu1 %v2338_v35  ;;  %v2163_v35 = vld [vmem:[%s3296_s10 + $0x160] sm:$0xf0] }
  0xd0   :  { %v704_v37 = vpop.f32.mrf.mxu2  ;;  %v680_v40 = vpop.f32.mrf.mxu0 }
  0xd1   :  { %v717_v38 = vpop.f32.mrf.mxu3  ;;  %v705_v39 = vadd.f32 %v704_v37, %v692_v36  ;;  %v693_v41 = vpop.f32.mrf.mxu1 }
  0xd2   :  { %v2337_v41 = vld [vmem:[#allocation4 + $0x10] sm:$0xff] }
  0xd3   :  { %v718_v43 = vadd.f32 %v717_v38, %v705_v39  ;;  %955 = vmatpush.bf16.msra.mxu1 %v2337_v41  ;;  %v2171_v41 = vld [vmem:[%s3296_s10 + $0x168] sm:$0xf0] }
  0xd5   :  { %v723_v44 = vrot.slane %v718_v43, 4  ;;  %v729_v45 = vmul.f32 %v718_v43, %v718_v43 }
  0xd7   :  { %v724_v47 = vadd.f32 %v723_v44, %v718_v43  ;;  %v730_v48 = vrot.slane %v729_v45, 4  ;;  %956 = vmatpush.bf16.msra.mxu1 %v2336_v46 }
  0xd8   :  { %v706_v49 = vpop.f32.mrf.mxu2 }
  0xd9   :  { %v719_v50 = vpop.f32.mrf.mxu3  ;;  %v725_v51 = vrot.slane %v724_v47, 2  ;;  %v731_v52 = vadd.f32 %v730_v48, %v729_v45 }
  0xda   :  { %v2335_v50 = vld [vmem:[#allocation4] sm:$0xff] }
  0xdb   :  { %v726_v54 = vadd.f32 %v725_v51, %v724_v47  ;;  %v732_v55 = vrot.slane %v731_v52, 2  ;;  %957 = vmatpush.bf16.msra.mxu1 %v2335_v50 }
  0xdd   :  { %v727_v56 = vrot.slane %v726_v54, 1  ;;  %v733_v57 = vadd.f32 %v732_v55, %v731_v52 }
  0xdf   :  { %v728_v59 = vadd.f32 %v727_v56, %v726_v54  ;;  %v734_v60 = vrot.slane %v733_v57, 1 }
  0xe1   :  { %v735_v61 = vadd.f32 %v734_v60, %v733_v57  ;;  %v736_v62 = vmul.f32 0.125, %v728_v59 }
  0xe3   :  { %v737_v0 = vmul.f32 0.125, %v735_v61  ;;  %v738_v1 = vmul.f32 %v736_v62, %v736_v62 }
  0xe5   :  { %v739_v3 = vsub.f32 %v737_v0, %v738_v1 }
  0xe7   :  { %v740_v4 = vmax.f32 %v739_v3, 0.0 }
  0xe9   :  { %v741_v5 = vadd.f32 1e-05, %v740_v4 }
  0xeb   :  { %2411 = vrsqrt.f32 %v741_v5  ;;  %vm748_vm1 = vweird.f32 %v741_v5 }
  0xf1   :  { %v2412_v6 = vpop.eup %2411 }
  0xf2   :  { %v743_v7 = vmul.f32 %v2412_v6, %v741_v5  ;;  %vm749_vm0 = vweird.f32 %v2412_v6 }
  0xf3   :  { %vm750_vm2 = vmor %vm748_vm1, %vm749_vm0 }
  0xf4   :  { %v744_v8 = vmul.f32 %v2412_v6, %v743_v7  ;;  %v2225_v7 = vld [vmem:[%s3296_s10 + $0x1c0] sm:$0xf] }
  0xf6   :  { %v745_v9 = vmul.f32 0.5, %v744_v8  ;;  %v2403_v8 = vld [vmem:[%s3296_s10 + $0x1dc] sm:$0xf0] }
  0xf8   :  { %v746_v10 = vsub.f32 1.5, %v745_v9  ;;  %v2399_v9 = vld [vmem:[%s3296_s10 + $0x1c4] sm:$0xf] }
  0xfa   :  { %v747_v12 = vmul.f32 %v2412_v6, %v746_v10  ;;  %v2226_v10 = vor.u32 %v2403_v8, %v2225_v7  ;;  %v2067_v7 = vld [vmem:[%s3296_s10 + $0xa0] sm:$0xf0]  ;;  %v2073_v8 = vld [vmem:[%s3296_s10 + $0x88] sm:$0xf] }
  0xfc   :  { %v751_v13 = vsel %vm750_vm2, %v2412_v6, %v747_v12  ;;  %v2233_v12 = vld [vmem:[%s3296_s10 + $0x1c8] sm:$0xf]  ;;  %1409 = vmatpush.bf16.msra.mxu2 %v2226_v10 }
  0xfd   :  { %v752_v14 = vmul.f32 %v751_v13, %v721_v11  ;;  %v2227_v11 = vld [vmem:[%s3296_s10 + $0x1e0] sm:$0xf0]  ;;  %v2404_v13 = vld [vmem:[%s3296_s10 + $0x1e4] sm:$0xf0] }
  0xff   :  { %v756_v16 = vperm.slane %v752_v14, 0  ;;  %v753_v17 = vmul.f32 %v752_v14, %v736_v62  ;;  %v843_v62 = vld [vmem:[%s3292_s6] sm:$0x1]  ;;  %v2230_v14 = vor.u32 %v2399_v9, %v2227_v11  ;;  %v2364_v9 = vld [vmem:[%s3296_s10 + $0xa4] sm:$0xf0] }
 0x100   :  { %v2074_v11 = vor.u32 %v2364_v9, %v2073_v8  ;;  %v2398_v8 = vld [vmem:[%s3296_s10 + $0x1b4] sm:$0xf0]  ;;  %v2394_v9 = vld [vmem:[%s3296_s10 + $0x19c] sm:$0xf] }
 0x101   :  { %v754_v18 = vsub.f32 %v722_v15, %v753_v17  ;;  %v758_v19 = vmul.f32 %v756_v16, %v718_v43  ;;  %v2234_v15 = vor.u32 %v2404_v13, %v2233_v12  ;;  %v2400_v16 = vld [vmem:[%s3296_s10 + $0x1cc] sm:$0xf]  ;;  %1422 = vmatpush.bf16.msra.mxu3 %v2230_v14 }
 0x102   :  { %v2235_v17 = vld [vmem:[%s3296_s10 + $0x1e8] sm:$0xf0] }
 0x103   :  { %v760_v20 = vperm.slane %v754_v18, 0  ;;  %v2238_v18 = vor.u32 %v2400_v16, %v2235_v17  ;;  %1435 = vmatpush.bf16.msrb.mxu0 %v2234_v15  ;;  %v2360_v12 = vld [vmem:[%s3296_s10 + $0x8c] sm:$0xf]  ;;  %v2033_v16 = vld [vmem:[%s3296_s10 + $0x40] sm:$0xf] }
 0x104   :  { %v2075_v13 = vld [vmem:[%s3296_s10 + $0xa8] sm:$0xf0]  ;;  %v2355_v17 = vld [vmem:[%s3296_s10 + $0x5c] sm:$0xf0] }
 0x105   :  { %v762_v21 = vadd.f32 %v760_v20, %v758_v19  ;;  %v2193_v19 = vld [vmem:[%s3296_s10 + $0x180] sm:$0xf]  ;;  %1448 = vmatpush.bf16.msrb.mxu1 %v2238_v18  ;;  %v2078_v14 = vor.u32 %v2360_v12, %v2075_v13  ;;  %v2351_v18 = vld [vmem:[%s3296_s10 + $0x44] sm:$0xf]  ;;  %v2219_v13 = vld [vmem:[%s3296_s10 + $0x1b8] sm:$0xf0] }
 0x106   :  { %v2395_v20 = vld [vmem:[%s3296_s10 + $0x19c] sm:$0xf0] }
 0x107   :  { %v763_v22 = vmax.f32 %v762_v21, 0.0  ;;  %v2391_v21 = vld [vmem:[%s3296_s10 + $0x184] sm:$0xf] }
 0x109   :  { %v764_v23 = vpack.c.bf16 %v763_v22, %v763_v22  ;;  %v2194_v22 = vor.u32 %v2395_v20, %v2193_v19 }
 0x10b   :  { %837 = vmatmul.bf16.vlgmr.msra.gmra.mxu0 %v764_v23  ;;  %v2195_v23 = vld [vmem:[%s3296_s10 + $0x1a0] sm:$0xf0]  ;;  %1410 = vmatpush.bf16.msra.mxu2 %v2194_v22 }
 0x10c   :  { %v2198_v26 = vor.u32 %v2391_v21, %v2195_v23  ;;  %v2034_v21 = vor.u32 %v2355_v17, %v2033_v16  ;;  %v2035_v22 = vld [vmem:[%s3296_s10 + $0x60] sm:$0xf0]  ;;  %v2041_v23 = vld [vmem:[%s3296_s10 + $0x48] sm:$0xf]  ;;  %v2222_v16 = vor.u32 %v2394_v9, %v2219_v13  ;;  %v2389_v17 = vld [vmem:[%s3296_s10 + $0x16c] sm:$0xf0] }
 0x10e   :  { %1423 = vmatpush.bf16.msra.mxu3 %v2198_v26  ;;  %v2352_v26 = vld [vmem:[%s3296_s10 + $0x4c] sm:$0xf] }
 0x188   :  { %v838_v27 = vpop.f32.mrf.mxu0 }
 0x189   :  { %v844_v28 = vrot.slane %v838_v27, 4  ;;  %v850_v29 = vmul.f32 %v838_v27, %v838_v27 }
 0x18b   :  { %v845_v31 = vadd.f32 %v844_v28, %v838_v27  ;;  %v851_v32 = vrot.slane %v850_v29, 4  ;;  %v2392_v28 = vld [vmem:[%s3296_s10 + $0x18c] sm:$0xf] }
 0x18d   :  { %v846_v33 = vrot.slane %v845_v31, 2  ;;  %v852_v34 = vadd.f32 %v851_v32, %v850_v29  ;;  %v2203_v29 = vld [vmem:[%s3296_s10 + $0x1a8] sm:$0xf0]  ;;  %v2387_v32 = vld [vmem:[%s3296_s10 + $0x15c] sm:$0xf0] }
 0x18e   :  { %v2206_v30 = vor.u32 %v2392_v28, %v2203_v29 }
 0x18f   :  { %v847_v36 = vadd.f32 %v846_v33, %v845_v31  ;;  %v853_v37 = vrot.slane %v852_v34, 2  ;;  %v2161_v31 = vld [vmem:[%s3296_s10 + $0x140] sm:$0xf]  ;;  %v2383_v33 = vld [vmem:[%s3296_s10 + $0x144] sm:$0xf] }
 0x190   :  { %v840_v38 = vpop.f32.mrf.mxu0  ;;  %1449 = vmatpush.bf16.msrb.mxu1 %v2206_v30 }
 0x191   :  { %v848_v39 = vrot.slane %v847_v36, 1  ;;  %v854_v40 = vadd.f32 %v853_v37, %v852_v34  ;;  %v2162_v34 = vor.u32 %v2387_v32, %v2161_v31  ;;  %v2388_v37 = vld [vmem:[%s3296_s10 + $0x164] sm:$0xf0]  ;;  %v2166_v38 = vor.u32 %v2383_v33, %v2163_v35  ;;  %v2001_v32 = vld [vmem:[%s3296_s10] sm:$0xf] }
 0x192   :  { %v2347_v33 = vld [vmem:[%s3296_s10 + $0x1c] sm:$0xf0] }
 0x193   :  { %v849_v42 = vadd.f32 %v848_v39, %v847_v36  ;;  %v855_v43 = vrot.slane %v854_v40, 1  ;;  %v2169_v36 = vld [vmem:[%s3296_s10 + $0x148] sm:$0xf]  ;;  %1411 = vmatpush.bf16.msra.mxu2 %v2162_v34  ;;  %1424 = vmatpush.bf16.msra.mxu3 %v2166_v38  ;;  %v2343_v34 = vld [vmem:[%s3296_s10 + $0x4] sm:$0xf] }
 0x194   :  { %v2170_v39 = vor.u32 %v2388_v37, %v2169_v36  ;;  %v2002_v37 = vor.u32 %v2347_v33, %v2001_v32  ;;  %v2003_v38 = vld [vmem:[%s3296_s10 + $0x20] sm:$0xf0]  ;;  %v2381_v32 = vld [vmem:[%s3296_s10 + $0x12c] sm:$0xf0]  ;;  %v2377_v33 = vld [vmem:[%s3296_s10 + $0x114] sm:$0xf] }
 0x195   :  { %v856_v44 = vadd.f32 %v855_v43, %v854_v40  ;;  %v857_v45 = vmul.f32 0.125, %v849_v42  ;;  %v2384_v40 = vld [vmem:[%s3296_s10 + $0x14c] sm:$0xf]  ;;  %v2129_v43 = vld [vmem:[%s3296_s10 + $0x100] sm:$0xf] }
 0x196   :  { %v2174_v42 = vor.u32 %v2384_v40, %v2171_v41  ;;  %v2006_v40 = vor.u32 %v2343_v34, %v2003_v38  ;;  %v2348_v41 = vld [vmem:[%s3296_s10 + $0x24] sm:$0xf0] }
 0x197   :  { %v858_v47 = vmul.f32 0.125, %v856_v44  ;;  %v859_v48 = vmul.f32 %v857_v45, %v857_v45  ;;  %v2379_v44 = vld [vmem:[%s3296_s10 + $0x11c] sm:$0xf0] }
 0x198   :  { %1450 = vmatpush.bf16.msrb.mxu1 %v2174_v42  ;;  %v2130_v46 = vor.u32 %v2379_v44, %v2129_v43  ;;  %v2344_v42 = vld [vmem:[%s3296_s10 + $0xc] sm:$0xf] }
 0x199   :  { %v860_v49 = vsub.f32 %v858_v47, %v859_v48  ;;  %v2131_v47 = vld [vmem:[%s3296_s10 + $0x120] sm:$0xf0]  ;;  %v2137_v48 = vld [vmem:[%s3296_s10 + $0x108] sm:$0xf]  ;;  %v2011_v43 = vld [vmem:[%s3296_s10 + $0x28] sm:$0xf0] }
 0x19a   :  { %1412 = vmatpush.bf16.msra.mxu2 %v2130_v46 }
 0x19b   :  { %v861_v51 = vmax.f32 %v860_v49, 0.0  ;;  %v2380_v49 = vld [vmem:[%s3296_s10 + $0x124] sm:$0xf0] }
 0x19d   :  { %v862_v52 = vadd.f32 1e-05, %v861_v51  ;;  %v2138_v51 = vor.u32 %v2380_v49, %v2137_v48  ;;  %v2241_v48 = vld [vmem:[%s3296_s10 + $0x1d0] sm:$0xf] }
 0x19e   :  { %v2405_v49 = vld [vmem:[%s3296_s10 + $0x1ec] sm:$0xf0] }
 0x19f   :  { %2413 = vrsqrt.f32 %v862_v52  ;;  %vm869_vm4 = vweird.f32 %v862_v52 }
 0x1a5   :  { %v2414_v53 = vpop.eup %2413 }
 0x1a6   :  { %v864_v54 = vmul.f32 %v2414_v53, %v862_v52  ;;  %vm870_vm3 = vweird.f32 %v2414_v53  ;;  %v2376_v52 = vld [vmem:[%s3296_s10 + $0x10c] sm:$0xf] }
 0x1a7   :  { %vm871_vm5 = vmor %vm869_vm4, %vm870_vm3 }
 0x1a8   :  { %v865_v55 = vmul.f32 %v2414_v53, %v864_v54 }
 0x1aa   :  { %v866_v56 = vmul.f32 0.5, %v865_v55  ;;  %v2097_v55 = vld [vmem:[%s3296_s10 + $0xc0] sm:$0xf] }
 0x1ac   :  { %v867_v57 = vsub.f32 1.5, %v866_v56  ;;  %v2371_v56 = vld [vmem:[%s3296_s10 + $0xdc] sm:$0xf0] }
 0x1ae   :  { %v868_v59 = vmul.f32 %v2414_v53, %v867_v57  ;;  %v2367_v57 = vld [vmem:[%s3296_s10 + $0xc4] sm:$0xf] }
 0x1b0   :  { %v872_v60 = vsel %vm871_vm5, %v2414_v53, %v868_v59  ;;  %v2139_v53 = vld [vmem:[%s3296_s10 + $0x128] sm:$0xf0]  ;;  %v2099_v59 = vld [vmem:[%s3296_s10 + $0xe0] sm:$0xf0] }
 0x1b1   :  { %v873_v61 = vmul.f32 %v872_v60, %v842_v58  ;;  %v2142_v54 = vor.u32 %v2376_v52, %v2139_v53  ;;  %v2098_v58 = vor.u32 %v2371_v56, %v2097_v55  ;;  %v2105_v60 = vld [vmem:[%s3296_s10 + $0xc8] sm:$0xf]  ;;  %v2401_v52 = vld [vmem:[%s3296_s10 + $0x1d4] sm:$0xf] }
 0x1b2   :  { %v2243_v53 = vld [vmem:[%s3296_s10 + $0x1f0] sm:$0xf0] }
 0x1b3   :  { %v874_v63 = vmul.f32 %v873_v61, %v857_v45  ;;  %v877_v0 = vperm.slane %v873_v61, 0  ;;  %v2375_v45 = vld [vmem:[%s3296_s10 + $0x104] sm:$0xf]  ;;  %1451 = vmatpush.bf16.msrb.mxu1 %v2142_v54  ;;  %v2372_v61 = vld [vmem:[%s3296_s10 + $0xe4] sm:$0xf0]  ;;  %1413 = vmatpush.bf16.msra.mxu2 %v2098_v58 }
 0x1b4   :  { %v2134_v50 = vor.u32 %v2375_v45, %v2131_v47  ;;  %v2014_v47 = vor.u32 %v2344_v42, %v2011_v43  ;;  %v2249_v54 = vld [vmem:[%s3296_s10 + $0x1d8] sm:$0xf] }
 0x1b5   :  { %v875_v1 = vsub.f32 %v843_v62, %v874_v63  ;;  %v879_v2 = vmul.f32 %v877_v0, %v838_v27  ;;  %v2202_v27 = vor.u32 %v2396_v25, %v2201_v24  ;;  %v2102_v62 = vor.u32 %v2367_v57, %v2099_v59  ;;  %v2368_v0 = vld [vmem:[%s3296_s10 + $0xcc] sm:$0xf]  ;;  %v2356_v25 = vld [vmem:[%s3296_s10 + $0x64] sm:$0xf0]  ;;  %v2406_v58 = vld [vmem:[%s3296_s10 + $0x1f4] sm:$0xf0] }
 0x1b6   :  { %1425 = vmatpush.bf16.msra.mxu3 %v2134_v50  ;;  %v2106_v63 = vor.u32 %v2372_v61, %v2105_v60  ;;  %v2038_v24 = vor.u32 %v2351_v18, %v2035_v22  ;;  %v2042_v30 = vor.u32 %v2356_v25, %v2041_v23  ;;  %v2246_v57 = vor.u32 %v2401_v52, %v2243_v53  ;;  %v2402_v59 = vld [vmem:[%s3296_s10 + $0x1dc] sm:$0xf]  ;;  %v2385_v18 = vld [vmem:[%s3296_s10 + $0x154] sm:$0xf]  ;;  %v2390_v25 = vld [vmem:[%s3296_s10 + $0x174] sm:$0xf0] }
 0x1b7   :  { %v881_v3 = vperm.slane %v875_v1, 0  ;;  %1436 = vmatpush.bf16.msrb.mxu0 %v2202_v27  ;;  %v2107_v1 = vld [vmem:[%s3296_s10 + $0xe8] sm:$0xf0]  ;;  %v2250_v60 = vor.u32 %v2406_v58, %v2249_v54  ;;  %v2251_v61 = vld [vmem:[%s3296_s10 + $0x1f8] sm:$0xf0] }
 0x1b8   :  { %v2043_v27 = vld [vmem:[%s3296_s10 + $0x68] sm:$0xf0]  ;;  %v2370_v54 = vld [vmem:[%s3296_s10 + $0xdc] sm:$0xf]  ;;  %v2365_v58 = vld [vmem:[%s3296_s10 + $0xac] sm:$0xf0] }
 0x1b9   :  { %v883_v4 = vadd.f32 %v881_v3, %v879_v2  ;;  %v2110_v2 = vor.u32 %v2368_v0, %v2107_v1  ;;  %v2065_v3 = vld [vmem:[%s3296_s10 + $0x80] sm:$0xf]  ;;  %v2046_v31 = vor.u32 %v2352_v26, %v2043_v27  ;;  %v2386_v27 = vld [vmem:[%s3296_s10 + $0x15c] sm:$0xf] }
 0x1ba   :  { %1426 = vmatpush.bf16.msra.mxu3 %v2102_v62  ;;  %v2209_v62 = vld [vmem:[%s3296_s10 + $0x190] sm:$0xf] }
 0x1bb   :  { %v884_v5 = vmax.f32 %v883_v4, 0.0  ;;  %1437 = vmatpush.bf16.msrb.mxu0 %v2170_v39  ;;  %v2363_v4 = vld [vmem:[%s3296_s10 + $0x9c] sm:$0xf0]  ;;  %1452 = vmatpush.bf16.msrb.mxu1 %v2110_v2  ;;  %v2009_v39 = vld [vmem:[%s3296_s10 + $0x8] sm:$0xf]  ;;  %v2254_v2 = vor.u32 %v2402_v59, %v2251_v61 }
 0x1bc   :  { %v2010_v46 = vor.u32 %v2348_v41, %v2009_v39  ;;  %v2155_v41 = vld [vmem:[%s3296_s10 + $0x138] sm:$0xf0]  ;;  %v2361_v59 = vld [vmem:[%s3296_s10 + $0x94] sm:$0xf] }
 0x1bd   :  { %v885_v6 = vpack.c.bf16 %v884_v5, %v884_v5  ;;  %v2359_v5 = vld [vmem:[%s3296_s10 + $0x84] sm:$0xf] }
 0x1be   :  { %v2070_v10 = vor.u32 %v2359_v5, %v2067_v7  ;;  %v2211_v5 = vld [vmem:[%s3296_s10 + $0x1b0] sm:$0xf0]  ;;  %v2217_v7 = vld [vmem:[%s3296_s10 + $0x198] sm:$0xf] }
 0x1bf   :  { %958 = vmatmul.bf16.vlgmr.msra.gmra.mxu1 %v885_v6  ;;  %1438 = vmatpush.bf16.msrb.mxu0 %v2138_v51  ;;  %v2066_v6 = vor.u32 %v2363_v4, %v2065_v3  ;;  %v2242_v51 = vor.u32 %v2405_v49, %v2241_v48  ;;  %v2393_v4 = vld [vmem:[%s3296_s10 + $0x194] sm:$0xf]  ;;  %v2218_v12 = vor.u32 %v2398_v8, %v2217_v7 }
 0x1c0   :  { %1427 = vmatpush.bf16.msra.mxu3 %v2070_v10  ;;  %1453 = vmatpush.bf16.msrb.mxu1 %v2078_v14  ;;  %v2177_v14 = vld [vmem:[%s3296_s10 + $0x150] sm:$0xf]  ;;  %v2115_v49 = vld [vmem:[%s3296_s10 + $0xf0] sm:$0xf0] }
 0x1c1   :  { %1414 = vmatpush.bf16.msra.mxu2 %v2066_v6  ;;  %v2214_v6 = vor.u32 %v2393_v4, %v2211_v5  ;;  %v2178_v22 = vor.u32 %v2389_v17, %v2177_v14  ;;  %v2357_v4 = vld [vmem:[%s3296_s10 + $0x6c] sm:$0xf0]  ;;  %v2051_v7 = vld [vmem:[%s3296_s10 + $0x70] sm:$0xf0]  ;;  %v2059_v17 = vld [vmem:[%s3296_s10 + $0x78] sm:$0xf0] }
 0x1c3   :  { %1439 = vmatpush.bf16.msrb.mxu0 %v2106_v63  ;;  %v2397_v63 = vld [vmem:[%s3296_s10 + $0x1ac] sm:$0xf0] }
 0x1c4   :  { %1428 = vmatpush.bf16.msra.mxu3 %v2038_v24  ;;  %1454 = vmatpush.bf16.msrb.mxu1 %v2046_v31  ;;  %v2210_v3 = vor.u32 %v2397_v63, %v2209_v62  ;;  %v2185_v24 = vld [vmem:[%s3296_s10 + $0x158] sm:$0xf]  ;;  %v2145_v31 = vld [vmem:[%s3296_s10 + $0x110] sm:$0xf] }
 0x1c5   :  { %1415 = vmatpush.bf16.msra.mxu2 %v2034_v21  ;;  %v2186_v26 = vor.u32 %v2390_v25, %v2185_v24  ;;  %v2146_v34 = vor.u32 %v2381_v32, %v2145_v31  ;;  %v2089_v62 = vld [vmem:[%s3296_s10 + $0x98] sm:$0xf]  ;;  %v2019_v24 = vld [vmem:[%s3296_s10 + $0x30] sm:$0xf0]  ;;  %v2027_v31 = vld [vmem:[%s3296_s10 + $0x38] sm:$0xf0] }
 0x1c6   :  { %v2366_v63 = vld [vmem:[%s3296_s10 + $0xb4] sm:$0xf0] }
 0x1c7   :  { %1440 = vmatpush.bf16.msrb.mxu0 %v2074_v11  ;;  %v2090_v5 = vor.u32 %v2366_v63, %v2089_v62 }
 0x1c8   :  { %1429 = vmatpush.bf16.msra.mxu3 %v2006_v40  ;;  %1455 = vmatpush.bf16.msrb.mxu1 %v2014_v47  ;;  %v2378_v40 = vld [vmem:[%s3296_s10 + $0x11c] sm:$0xf]  ;;  %v2369_v47 = vld [vmem:[%s3296_s10 + $0xd4] sm:$0xf] }
 0x1c9   :  { %1416 = vmatpush.bf16.msra.mxu2 %v2002_v37  ;;  %v2382_v37 = vld [vmem:[%s3296_s10 + $0x134] sm:$0xf0]  ;;  %v2118_v52 = vor.u32 %v2369_v47, %v2115_v49 }
 0x1cb   :  { %1441 = vmatpush.bf16.msrb.mxu0 %v2042_v30 }
 0x1cc   :  { %1474 = vmatpush.bf16.msrb.mxu3 %v2246_v57  ;;  %1500 = vmatpush.bf16.msra.mxu1 %v2254_v2  ;;  %v2091_v2 = vld [vmem:[%s3296_s10 + $0xb8] sm:$0xf0] }
 0x1cd   :  { %1461 = vmatpush.bf16.msrb.mxu2 %v2242_v51  ;;  %v2374_v51 = vld [vmem:[%s3296_s10 + $0xf4] sm:$0xf0] }
 0x1cf   :  { %1442 = vmatpush.bf16.msrb.mxu0 %v2010_v46  ;;  %v2373_v46 = vld [vmem:[%s3296_s10 + $0xec] sm:$0xf0] }
 0x1d0   :  { %1475 = vmatpush.bf16.msrb.mxu3 %v2214_v6  ;;  %1501 = vmatpush.bf16.msra.mxu1 %v2222_v16  ;;  %v2353_v6 = vld [vmem:[%s3296_s10 + $0x54] sm:$0xf]  ;;  %v2354_v16 = vld [vmem:[%s3296_s10 + $0x5c] sm:$0xf] }
 0x1d1   :  { %1462 = vmatpush.bf16.msrb.mxu2 %v2210_v3  ;;  %v2049_v3 = vld [vmem:[%s3296_s10 + $0x50] sm:$0xf]  ;;  %v2062_v25 = vor.u32 %v2354_v16, %v2059_v17 }
 0x1d2   :  { %v2050_v14 = vor.u32 %v2357_v4, %v2049_v3 }
 0x1d3   :  { %1487 = vmatpush.bf16.msra.mxu0 %v2250_v60  ;;  %v2083_v60 = vld [vmem:[%s3296_s10 + $0xb0] sm:$0xf0] }
 0x1d5   :  { %1463 = vmatpush.bf16.msrb.mxu2 %v2178_v22 }
 0x1d7   :  { %1488 = vmatpush.bf16.msra.mxu0 %v2218_v12  ;;  %v2358_v12 = vld [vmem:[%s3296_s10 + $0x74] sm:$0xf0] }
 0x1d9   :  { %1464 = vmatpush.bf16.msrb.mxu2 %v2146_v34 }
 0x1db   :  { %1489 = vmatpush.bf16.msra.mxu0 %v2186_v26  ;;  %v2025_v26 = vld [vmem:[%s3296_s10 + $0x18] sm:$0xf] }
 0x23c   :  { %v2936_v15 = vpop.f32.mrf.mxu1 }
 0x23d   :  { %v965_v19 = vrot.slane %v2936_v15, 4  ;;  %v971_v20 = vmul.f32 %v2936_v15, %v2936_v15 }
 0x23f   :  { %v966_v28 = vadd.f32 %v965_v19, %v2936_v15  ;;  %v972_v29 = vrot.slane %v971_v20, 4  ;;  %v2179_v19 = vld [vmem:[%s3296_s10 + $0x170] sm:$0xf0] }
 0x240   :  { %v2182_v23 = vor.u32 %v2385_v18, %v2179_v19  ;;  %v2054_v18 = vor.u32 %v2353_v6, %v2051_v7  ;;  %v2017_v19 = vld [vmem:[%s3296_s10 + $0x10] sm:$0xf] }
 0x241   :  { %v967_v35 = vrot.slane %v966_v28, 2  ;;  %v973_v36 = vadd.f32 %v972_v29, %v971_v20 }
 0x242   :  { %1476 = vmatpush.bf16.msrb.mxu3 %v2182_v23  ;;  %v2345_v23 = vld [vmem:[%s3296_s10 + $0x14] sm:$0xf] }
 0x243   :  { %v968_v44 = vadd.f32 %v967_v35, %v966_v28  ;;  %v974_v45 = vrot.slane %v973_v36, 2  ;;  %v2187_v28 = vld [vmem:[%s3296_s10 + $0x178] sm:$0xf0]  ;;  %v2147_v35 = vld [vmem:[%s3296_s10 + $0x130] sm:$0xf0]  ;;  %v2022_v32 = vor.u32 %v2345_v23, %v2019_v24 }
 0x244   :  { %v961_v50 = vpop.f32.mrf.mxu1  ;;  %v2190_v30 = vor.u32 %v2386_v27, %v2187_v28  ;;  %v2150_v39 = vor.u32 %v2377_v33, %v2147_v35  ;;  %v2350_v27 = vld [vmem:[%s3296_s10 + $0x34] sm:$0xf0] }
 0x245   :  { %v969_v55 = vrot.slane %v968_v44, 1  ;;  %v975_v56 = vadd.f32 %v974_v45, %v973_v36  ;;  %v2153_v36 = vld [vmem:[%s3296_s10 + $0x118] sm:$0xf]  ;;  %v2113_v45 = vld [vmem:[%s3296_s10 + $0xd0] sm:$0xf]  ;;  %v2026_v34 = vor.u32 %v2350_v27, %v2025_v26 }
 0x246   :  { %v2154_v42 = vor.u32 %v2382_v37, %v2153_v36  ;;  %1502 = vmatpush.bf16.msra.mxu1 %v2190_v30  ;;  %1477 = vmatpush.bf16.msrb.mxu3 %v2150_v39  ;;  %v2114_v48 = vor.u32 %v2373_v46, %v2113_v45  ;;  %v2121_v50 = vld [vmem:[%s3296_s10 + $0xd8] sm:$0xf]  ;;  %v2346_v30 = vld [vmem:[%s3296_s10 + $0x1c] sm:$0xf]  ;;  %v963_v36 = vld [vmem:[%s3294_s8] sm:$0x1] }
 0x247   :  { %v970_v0 = vadd.f32 %v969_v55, %v968_v44  ;;  %v976_v1 = vrot.slane %v975_v56, 1  ;;  %v2158_v44 = vor.u32 %v2378_v40, %v2155_v41  ;;  %v2122_v53 = vor.u32 %v2374_v51, %v2121_v50  ;;  %v2123_v55 = vld [vmem:[%s3296_s10 + $0xf8] sm:$0xf0]  ;;  %v964_v40 = vld [vmem:[%s3295_s9] sm:$0x1] }
 0x248   :  { %1490 = vmatpush.bf16.msra.mxu0 %v2154_v42  ;;  %v2126_v57 = vor.u32 %v2370_v54, %v2123_v55  ;;  %1465 = vmatpush.bf16.msrb.mxu2 %v2114_v48  ;;  %v2030_v35 = vor.u32 %v2346_v30, %v2027_v31 }
 0x249   :  { %v977_v10 = vadd.f32 %v976_v1, %v975_v56  ;;  %v3035_v11 = vmul.f32 0.125, %v970_v0  ;;  %v2081_v56 = vld [vmem:[%s3296_s10 + $0x90] sm:$0xf]  ;;  %v2362_v0 = vld [vmem:[%s3296_s10 + $0x9c] sm:$0xf]  ;;  %v2086_v1 = vor.u32 %v2361_v59, %v2083_v60 }
 0x24a   :  { %1503 = vmatpush.bf16.msra.mxu1 %v2158_v44  ;;  %v2082_v61 = vor.u32 %v2365_v58, %v2081_v56  ;;  %1478 = vmatpush.bf16.msrb.mxu3 %v2118_v52  ;;  %v2094_v9 = vor.u32 %v2362_v0, %v2091_v2 }
 0x24b   :  { %v979_v20 = vmul.f32 0.125, %v977_v10  ;;  %v980_v21 = vmul.f32 %v3035_v11, %v3035_v11  ;;  %v2057_v10 = vld [vmem:[%s3296_s10 + $0x58] sm:$0xf] }
 0x24c   :  { %1491 = vmatpush.bf16.msra.mxu0 %v2122_v53  ;;  %1466 = vmatpush.bf16.msrb.mxu2 %v2082_v61  ;;  %v2058_v22 = vor.u32 %v2358_v12, %v2057_v10 }
 0x24d   :  { %v981_v29 = vsub.f32 %v979_v20, %v980_v21  ;;  %v2349_v20 = vld [vmem:[%s3296_s10 + $0x2c] sm:$0xf0] }
 0x24e   :  { %1504 = vmatpush.bf16.msra.mxu1 %v2126_v57  ;;  %1479 = vmatpush.bf16.msrb.mxu3 %v2086_v1 }
 0x24f   :  { %v982_v38 = vmax.f32 %v981_v29, 0.0  ;;  %v2018_v29 = vor.u32 %v2349_v20, %v2017_v19 }
 0x250   :  { %1492 = vmatpush.bf16.msra.mxu0 %v2090_v5  ;;  %1467 = vmatpush.bf16.msrb.mxu2 %v2050_v14 }
 0x251   :  { %v3090_v43 = vadd.f32 1e-05, %v982_v38 }
 0x252   :  { %1505 = vmatpush.bf16.msra.mxu1 %v2094_v9  ;;  %1480 = vmatpush.bf16.msrb.mxu3 %v2054_v18 }
 0x253   :  { %2415 = vrsqrt.f32 %v3090_v43  ;;  %vm990_vm7 = vweird.f32 %v3090_v43 }
 0x254   :  { %1493 = vmatpush.bf16.msra.mxu0 %v2058_v22  ;;  %1468 = vmatpush.bf16.msrb.mxu2 %v2018_v29 }
 0x256   :  { %1506 = vmatpush.bf16.msra.mxu1 %v2062_v25  ;;  %1481 = vmatpush.bf16.msrb.mxu3 %v2022_v32 }
 0x258   :  { %1494 = vmatpush.bf16.msra.mxu0 %v2026_v34 }
 0x259   :  { %v2416_v8 = vpop.eup %2415 }
 0x25a   :  { %v985_v13 = vmul.f32 %v2416_v8, %v3090_v43  ;;  %vm991_vm6 = vweird.f32 %v2416_v8  ;;  %1507 = vmatpush.bf16.msra.mxu1 %v2030_v35 }
 0x25b   :  { %vm992_vm8 = vmor %vm990_vm7, %vm991_vm6 }
 0x25c   :  { %v986_v21 = vmul.f32 %v2416_v8, %v985_v13 }
 0x25e   :  { %v987_v28 = vmul.f32 0.5, %v986_v21 }
 0x260   :  { %v988_v33 = vsub.f32 1.5, %v987_v28 }
 0x262   :  { %v989_v37 = vmul.f32 %v2416_v8, %v988_v33 }
 0x264   :  { %v993_v38 = vsel %vm992_vm8, %v2416_v8, %v989_v37 }
 0x265   :  { %v994_v39 = vmul.f32 %v993_v38, %v963_v36 }
 0x267   :  { %v995_v41 = vmul.f32 %v994_v39, %v3035_v11  ;;  %v998_v42 = vperm.slane %v994_v39, 0  ;;  %v3202_v11 = vld [vmem:[%s3297_s11] sm:$0xff] }
 0x268   :  { %v1075_v49 = vperm.slane %v3202_v11, 2  ;;  %v1073_v54 = vperm.slane %v3202_v11, 0  ;;  %v1074_v55 = vperm.slane %v3202_v11, 1  ;;  %v1079_v8 = vperm.slane %v3202_v11, 6 }
 0x269   :  { %v996_v44 = vsub.f32 %v964_v40, %v995_v41  ;;  %v1000_v45 = vmul.f32 %v998_v42, %v2936_v15  ;;  %v1076_v15 = vperm.slane %v3202_v11, 3  ;;  %v1080_v9 = vperm.slane %v3202_v11, 7 }
 0x26a   :  { %v1077_v22 = vperm.slane %v3202_v11, 4  ;;  %v1078_v26 = vperm.slane %v3202_v11, 5 }
 0x26b   :  { %v1002_v46 = vperm.slane %v996_v44, 0 }
 0x26d   :  { %v1004_v47 = vadd.f32 %v1002_v46, %v1000_v45 }
 0x26f   :  { %v1005_v43 = vmax.f32 %v1004_v47, 0.0 }
 0x271   :  { %v1006_v48 = vpack.c.bf16 %v1005_v43, %v1005_v43 }
 0x273   :  { %1417 = vmatmul.bf16.vlgmr.msra.gmra.mxu2 %v1006_v48  ;;  %1430 = vmatmul.bf16.vlgmr.msra.gmra.mxu3 %v1006_v48 }
 0x274   :  { %1443 = vmatmul.bf16.vlgmr.msrb.gmra.mxu0 %v1006_v48  ;;  %1456 = vmatmul.bf16.vlgmr.msrb.gmra.mxu1 %v1006_v48 }
 0x283   :  { %1469 = vmatmul.bf16.vlgmr.msrb.gmra.mxu2 %v1006_v48  ;;  %1482 = vmatmul.bf16.vlgmr.msrb.gmra.mxu3 %v1006_v48 }
 0x284   :  { %1495 = vmatmul.bf16.vlgmr.msra.gmra.mxu0 %v1006_v48  ;;  %1508 = vmatmul.bf16.vlgmr.msra.gmra.mxu1 %v1006_v48 }
 0x2f1   :  { %v1444_v50 = vpop.f32.mrf.mxu0  ;;  %v1457_v51 = vpop.f32.mrf.mxu1 }
 0x2f2   :  { %v1445_v52 = vadd.f32 %v1444_v50, %v1075_v49  ;;  %v1458_v53 = vadd.f32 %v1457_v51, %v1076_v15 }
 0x2f4   :  { %v2257_v56 = vmul.f32 -1.442695, %v1445_v52  ;;  %v2258_v57 = vmul.f32 -1.442695, %v1458_v53 }
 0x2f6   :  { %2417 = vpow2.f32 %v2257_v56  ;;  %v1418_v58 = vpop.f32.mrf.mxu2  ;;  %v1431_v59 = vpop.f32.mrf.mxu3 }
 0x2f7   :  { %2419 = vpow2.f32 %v2258_v57  ;;  %v1419_v60 = vadd.f32 %v1418_v58, %v1073_v54  ;;  %v1432_v61 = vadd.f32 %v1431_v59, %v1074_v55 }
 0x2f9   :  { %v2255_v62 = vmul.f32 -1.442695, %v1419_v60  ;;  %v2256_v63 = vmul.f32 -1.442695, %v1432_v61  ;;  %v1446_v0 = vpop.f32.mrf.mxu0  ;;  %v1459_v1 = vpop.f32.mrf.mxu1 }
 0x2fb   :  { %2421 = vpow2.f32 %v2255_v62 }
 0x2fc   :  { %v2418_v2 = vpop.eup %2417  ;;  %2423 = vpow2.f32 %v2256_v63 }
 0x2fd   :  { %v2420_v3 = vpop.eup %2419  ;;  %v1539_v4 = vadd.f32 1.0, %v2418_v2 }
 0x2fe   :  { %v3208_v5 = vadd.f32 1.0, %v2420_v3  ;;  %v1420_v6 = vpop.f32.mrf.mxu2  ;;  %v1433_v7 = vpop.f32.mrf.mxu3 }
 0x2ff   :  { %2425 = vrcp.f32 %v1539_v4  ;;  %v1584_v17 = vand.u32 2147483647, %v1539_v4  ;;  %v1586_v18 = vand.u32 2147483648, %v1539_v4  ;;  %vm1580_vm9 = vweird.f32 %v1539_v4 }
 0x300   :  { %2427 = vrcp.f32 %v3208_v5  ;;  %v1599_v24 = vand.u32 2147483647, %v3208_v5  ;;  %v1601_v25 = vand.u32 2147483648, %v3208_v5  ;;  %vm1595_vm11 = vweird.f32 %v3208_v5 }
 0x301   :  { %v2422_v10 = vpop.eup %2421  ;;  %v1496_v12 = vpop.f32.mrf.mxu0  ;;  %vm3223_vm10 = vcmp.eq.f32.partialorder %v1584_v17, 8.507059e+37  ;;  %v1587_v32 = vor.u32 1.1754944e-38, %v1586_v18 }
 0x302   :  { %v1509_v13 = vpop.f32.mrf.mxu1  ;;  %v2424_v14 = vpop.eup %2423  ;;  %v3213_v16 = vadd.f32 1.0, %v2422_v10  ;;  %v1497_v20 = vadd.f32 %v1496_v12, %v1079_v8  ;;  %vm3229_vm12 = vcmp.eq.f32.partialorder %v1599_v24, 8.507059e+37  ;;  %v1602_v40 = vor.u32 1.1754944e-38, %v1601_v25 }
 0x303   :  { %v3215_v19 = vadd.f32 1.0, %v2424_v14  ;;  %v1510_v21 = vadd.f32 %v1509_v13, %v1080_v9 }
 0x304   :  { %2429 = vrcp.f32 %v3213_v16  ;;  %v2261_v35 = vmul.f32 -1.442695, %v1497_v20  ;;  %v1554_v15 = vand.u32 2147483647, %v3213_v16  ;;  %v1556_v50 = vand.u32 2147483648, %v3213_v16 }
 0x305   :  { %v2426_v23 = vpop.eup %2425  ;;  %2431 = vrcp.f32 %v3215_v19  ;;  %v2262_v36 = vmul.f32 -1.442695, %v1510_v21  ;;  %v1571_v57 = vand.u32 2147483648, %v3215_v19  ;;  %v1569_v2 = vand.u32 2147483647, %v3215_v19 }
 0x306   :  { %v2428_v27 = vpop.eup %2427  ;;  %v1576_v28 = vmul.f32 %v2426_v23, %v1539_v4  ;;  %v1470_v29 = vpop.f32.mrf.mxu2  ;;  %vm1581_vm13 = vweird.f32 %v2426_v23  ;;  %2433 = vpow2.f32 %v2261_v35  ;;  %vm1550_vm3 = vweird.f32 %v3213_v16 }
 0x307   :  { %v1483_v30 = vpop.f32.mrf.mxu3  ;;  %v1591_v33 = vmul.f32 %v2428_v27, %v3208_v5  ;;  %v1471_v37 = vadd.f32 %v1470_v29, %v1077_v22  ;;  %vm1596_vm14 = vweird.f32 %v2428_v27  ;;  %2435 = vpow2.f32 %v2262_v36  ;;  %vm1582_vm15 = vmor %vm1580_vm9, %vm1581_vm13 }
 0x308   :  { %v1577_v34 = vsub.f32 1.0, %v1576_v28  ;;  %v1484_v41 = vadd.f32 %v1483_v30, %v1078_v26  ;;  %vm1597_vm0 = vmor %vm1595_vm11, %vm1596_vm14  ;;  %v1557_v6 = vor.u32 1.1754944e-38, %v1556_v50  ;;  %vm1565_vm5 = vweird.f32 %v3215_v19 }
 0x309   :  { %v1592_v38 = vsub.f32 1.0, %v1591_v33  ;;  %v1498_v42 = vpop.f32.mrf.mxu0  ;;  %v2259_v47 = vmul.f32 -1.442695, %v1471_v37  ;;  %vm1555_vm6 = vcmp.eq.f32.partialorder %v1554_v15, 8.507059e+37  ;;  %v1572_v12 = vor.u32 1.1754944e-38, %v1571_v57 }
 0x30a   :  { %v1511_v44 = vpop.f32.mrf.mxu1  ;;  %v2430_v45 = vpop.eup %2429  ;;  %v1578_v46 = vmul.f32 %v2426_v23, %v1577_v34  ;;  %v2260_v54 = vmul.f32 -1.442695, %v1484_v41  ;;  %vm1570_vm8 = vcmp.eq.f32.partialorder %v1569_v2, 8.507059e+37 }
 0x30b   :  { %v2432_v43 = vpop.eup %2431  ;;  %v1593_v48 = vmul.f32 %v2428_v27, %v1592_v38  ;;  %v1546_v11 = vmul.f32 %v2430_v45, %v3213_v16  ;;  %2437 = vpow2.f32 %v2259_v47  ;;  %vm1551_vm1 = vweird.f32 %v2430_v45 }
 0x30c   :  { %v1579_v49 = vadd.f32 %v2426_v23, %v1578_v46  ;;  %v1561_v51 = vmul.f32 %v2432_v43, %v3215_v19  ;;  %2439 = vpow2.f32 %v2260_v54  ;;  %v2434_v63 = vpop.eup %2433  ;;  %vm1566_vm2 = vweird.f32 %v2432_v43  ;;  %vm1552_vm4 = vmor %vm1550_vm3, %vm1551_vm1 }
 0x30d   :  { %v1594_v52 = vadd.f32 %v2428_v27, %v1593_v48  ;;  %v1547_v53 = vsub.f32 1.0, %v1546_v11  ;;  %v2436_v3 = vpop.eup %2435  ;;  %v1543_v5 = vadd.f32 1.0, %v2434_v63  ;;  %vm1567_vm7 = vmor %vm1565_vm5, %vm1566_vm2 }
 0x30e   :  { %v1583_v55 = vsel %vm1582_vm15, %v2426_v23, %v1579_v49  ;;  %v1562_v56 = vsub.f32 1.0, %v1561_v51  ;;  %v1472_v58 = vpop.f32.mrf.mxu2  ;;  %v1544_v8 = vadd.f32 1.0, %v2436_v3 }
 0x30f   :  { %v1485_v59 = vpop.f32.mrf.mxu3  ;;  %v1588_v60 = vsel %vm3223_vm10, %v1587_v32, %v1583_v55  ;;  %v1598_v61 = vsel %vm1597_vm0, %v2428_v27, %v1594_v52  ;;  %v1548_v62 = vmul.f32 %v2430_v45, %v1547_v53  ;;  %2441 = vrcp.f32 %v1543_v5 }
 0x310   :  { %1667 = vst [vmem:[%s3298_s12 + $0x10] sm:$0xff] %v1588_v60  ;;  %v1603_v0 = vsel %vm3229_vm12, %v1602_v40, %v1598_v61  ;;  %v1563_v1 = vmul.f32 %v2432_v43, %v1562_v56  ;;  %2443 = vrcp.f32 %v1544_v8  ;;  %v1644_v23 = vand.u32 2147483647, %v1543_v5 }
 0x311   :  { %1668 = vst [vmem:[%s3298_s12 + $0x18] sm:$0xff] %v1603_v0  ;;  %v1549_v4 = vadd.f32 %v2430_v45, %v1548_v62  ;;  %v2438_v9 = vpop.eup %2437  ;;  %v1646_v26 = vand.u32 2147483648, %v1543_v5  ;;  %v1659_v27 = vand.u32 2147483647, %v1544_v8  ;;  %v1661_v29 = vand.u32 2147483648, %v1544_v8 }
 0x312   :  { %v1564_v7 = vadd.f32 %v2432_v43, %v1563_v1  ;;  %v2440_v16 = vpop.eup %2439  ;;  %v1541_v18 = vadd.f32 1.0, %v2438_v9  ;;  %vm1640_vm9 = vweird.f32 %v1543_v5  ;;  %vm3262_vm11 = vcmp.eq.f32.partialorder %v1644_v23, 8.507059e+37 }
 0x313   :  { %v1553_v10 = vsel %vm1552_vm4, %v2430_v45, %v1549_v4  ;;  %v1542_v19 = vadd.f32 1.0, %v2440_v16  ;;  %vm1655_vm12 = vweird.f32 %v1544_v8  ;;  %v1647_v37 = vor.u32 1.1754944e-38, %v1646_v26 }
 0x314   :  { %v1558_v13 = vsel %vm1555_vm6, %v1557_v6, %v1553_v10  ;;  %v1568_v14 = vsel %vm1567_vm7, %v2432_v43, %v1564_v7  ;;  %2445 = vrcp.f32 %v1541_v18  ;;  %vm3266_vm14 = vcmp.eq.f32.partialorder %v1659_v27, 8.507059e+37 }
 0x315   :  { %1665 = vst [vmem:[%s3298_s12] sm:$0xff] %v1558_v13  ;;  %v1573_v17 = vsel %vm1570_vm8, %v1572_v12, %v1568_v14  ;;  %v2442_v20 = vpop.eup %2441  ;;  %2447 = vrcp.f32 %v1542_v19  ;;  %v1662_v41 = vor.u32 1.1754944e-38, %v1661_v29  ;;  %v1614_v44 = vand.u32 2147483647, %v1541_v18 }
 0x316   :  { %1666 = vst [vmem:[%s3298_s12 + $0x8] sm:$0xff] %v1573_v17  ;;  %v2444_v21 = vpop.eup %2443  ;;  %v1636_v22 = vmul.f32 %v2442_v20, %v1543_v5  ;;  %vm1641_vm10 = vweird.f32 %v2442_v20  ;;  %v1616_v46 = vand.u32 2147483648, %v1541_v18  ;;  %v1631_v43 = vand.u32 2147483648, %v1542_v19 }
 0x317   :  { %v1651_v24 = vmul.f32 %v2444_v21, %v1544_v8  ;;  %vm1656_vm13 = vweird.f32 %v2444_v21  ;;  %vm1642_vm15 = vmor %vm1640_vm9, %vm1641_vm10  ;;  %v1629_v51 = vand.u32 2147483647, %v1542_v19  ;;  %vm1610_vm3 = vweird.f32 %v1541_v18 }
 0x318   :  { %v1637_v25 = vsub.f32 1.0, %v1636_v22  ;;  %vm1657_vm0 = vmor %vm1655_vm12, %vm1656_vm13  ;;  %v1617_v53 = vor.u32 1.1754944e-38, %v1616_v46  ;;  %vm1625_vm5 = vweird.f32 %v1542_v19  ;;  %vm1615_vm6 = vcmp.eq.f32.partialorder %v1614_v44, 8.507059e+37 }
 0x319   :  { %v1652_v28 = vsub.f32 1.0, %v1651_v24  ;;  %v1632_v56 = vor.u32 1.1754944e-38, %v1631_v43  ;;  %vm1630_vm8 = vcmp.eq.f32.partialorder %v1629_v51, 8.507059e+37 }
 0x31a   :  { %v2446_v30 = vpop.eup %2445  ;;  %v1638_v31 = vmul.f32 %v2442_v20, %v1637_v25 }
 0x31b   :  { %v2448_v33 = vpop.eup %2447  ;;  %v1653_v34 = vmul.f32 %v2444_v21, %v1652_v28  ;;  %v1606_v35 = vmul.f32 %v2446_v30, %v1541_v18  ;;  %vm1611_vm1 = vweird.f32 %v2446_v30 }
 0x31c   :  { %v1639_v36 = vadd.f32 %v2442_v20, %v1638_v31  ;;  %v1621_v39 = vmul.f32 %v2448_v33, %v1542_v19  ;;  %vm1626_vm2 = vweird.f32 %v2448_v33  ;;  %vm1612_vm4 = vmor %vm1610_vm3, %vm1611_vm1 }
 0x31d   :  { %v1654_v40 = vadd.f32 %v2444_v21, %v1653_v34  ;;  %v1607_v42 = vsub.f32 1.0, %v1606_v35  ;;  %vm1627_vm7 = vmor %vm1625_vm5, %vm1626_vm2 }
 0x31e   :  { %v1643_v45 = vsel %vm1642_vm15, %v2442_v20, %v1639_v36  ;;  %v1622_v47 = vsub.f32 1.0, %v1621_v39 }
 0x31f   :  { %v1648_v48 = vsel %vm3262_vm11, %v1647_v37, %v1643_v45  ;;  %v1658_v11 = vsel %vm1657_vm0, %v2444_v21, %v1654_v40  ;;  %v1608_v49 = vmul.f32 %v2446_v30, %v1607_v42 }
 0x320   :  { %1671 = vst [vmem:[%s3298_s12 + $0x30] sm:$0xff] %v1648_v48  ;;  %v1663_v15 = vsel %vm3266_vm14, %v1662_v41, %v1658_v11  ;;  %v1623_v50 = vmul.f32 %v2448_v33, %v1622_v47 }
 0x321   :  { %1672 = vst [vmem:[%s3298_s12 + $0x38] sm:$0xff] %v1663_v15  ;;  %v1609_v52 = vadd.f32 %v2446_v30, %v1608_v49 }
 0x322   :  { %v1624_v54 = vadd.f32 %v2448_v33, %v1623_v50 }
 0x323   :  { %v1613_v55 = vsel %vm1612_vm4, %v2446_v30, %v1609_v52 }
 0x324   :  { %v1618_v57 = vsel %vm1615_vm6, %v1617_v53, %v1613_v55  ;;  %v1628_v58 = vsel %vm1627_vm7, %v2448_v33, %v1624_v54 }
 0x325   :  { %1669 = vst [vmem:[%s3298_s12 + $0x20] sm:$0xff] %v1618_v57  ;;  %v1633_v59 = vsel %vm1630_vm8, %v1632_v56, %v1628_v58 }
 0x326   :  { %1670 = vst [vmem:[%s3298_s12 + $0x28] sm:$0xff] %v1633_v59 }
 0x327   :  { %1677 = vsyncpa [#allocation3], 1 }
 0x328   :  { %1678 = vsyncpa [#allocation5], 1 }

</bundles_post_ra>
